<compile_context>
chip_gen: v5e
topology: v5e:2x2
jax: 0.10.0
libtpu: 0.0.40
codegen_flags: <defaults>
</compile_context>

<pallas_src>
import functools

import jax
import jax.numpy as jnp
from jax import lax
from jax.experimental import pallas as pl
from jax.experimental.pallas import tpu as pltpu


def _round_up(v, m):
    return ((v + m - 1) // m) * m


# ----------------------------------------------------------------------------
# Pallas kernel (one grid step = one chunk of Tc timesteps)
# ----------------------------------------------------------------------------
def _lstm_attention_kernel(
    x_ref,      # (Tc, Bp, E)   time-major input chunk
    wih_ref,    # (E, 4*Hp)     input->gates weights (per-gate 128-lane-aligned blocks)
    whh_ref,    # (Hp, 4*Hp)    hidden->gates weights
    b_ref,      # (1, 4*Hp)     combined bias (b_ih + b_hh)
    wcls_ref,   # (Hp, D_out)   classifier weight
    bcls_ref,   # (1, D_out)    classifier bias
    out_ref,    # (Bp, D_out)   final output (written on the last grid step)
    seq_ref,    # (T, Bp, Hp)   VMEM scratch: full LSTM output sequence
    h_ref,      # (Bp, Hp)      VMEM scratch: hidden-state carry across grid steps
    c_ref,      # (Bp, Hp)      VMEM scratch: cell-state carry across grid steps
    *,
    use_attention: bool,
):
    t_blk = pl.program_id(0)
    n_blk = pl.num_programs(0)
    Tc, Bp, E = x_ref.shape
    Hp = whh_ref.shape[0]

    @pl.when(t_blk == 0)
    def _():
        h_ref[...] = jnp.zeros_like(h_ref)
        c_ref[...] = jnp.zeros_like(c_ref)

    # Hoisted input projection: one large MXU matmul per chunk, bias folded in,
    # done OUTSIDE the serial recurrence.
    x_chunk = x_ref[...].reshape(Tc * Bp, E)
    xproj = (
        jnp.dot(x_chunk, wih_ref[...], preferred_element_type=jnp.float32)
        + b_ref[...]
    )  # (Tc*Bp, 4*Hp)

    whh = whh_ref[...]
    h = h_ref[...]
    c = c_ref[...]
    t0 = t_blk * Tc

    # Statically unrolled recurrence (Tc is small): per step a single MXU matmul plus
    # VPU/EUP gate math; gate slices are lane-aligned 128-blocks (Hp % 128 == 0).
    for tt in range(Tc):
        gate_x = xproj[tt * Bp:(tt + 1) * Bp, :]                      # static slice
        gates = gate_x + jnp.dot(h, whh, preferred_element_type=jnp.float32)
        i_g = jax.nn.sigmoid(gates[:, 0 * Hp:1 * Hp])
        f_g = jax.nn.sigmoid(gates[:, 1 * Hp:2 * Hp])
        g_g = jnp.tanh(gates[:, 2 * Hp:3 * Hp])
        o_g = jax.nn.sigmoid(gates[:, 3 * Hp:4 * Hp])
        c = f_g * c + i_g * g_g
        h = o_g * jnp.tanh(c)
        seq_ref[t0 + tt] = h                                          # lstm_output[t]

    h_ref[...] = h
    c_ref[...] = c

    @pl.when(t_blk == n_blk - 1)
    def _():
        if use_attention:
            # (T, Bp, Hp) -> (Bp, T, Hp) once (lane-layout-aware relayout), then
            # flash-style batched MXU contractions instead of VPU-mul + XLU reduce.
            os_ = pltpu.einshape("tbh->bth", seq_ref[...])            # (Bp, T, Hp)
            attn = jnp.einsum(
                "bth,bsh->bts", os_, h[:, None, :],
                preferred_element_type=jnp.float32)[..., 0]           # (Bp, T)
            attn = attn - jnp.max(attn, axis=1, keepdims=True)
            e = jnp.exp(attn)
            soft = e * pl.reciprocal(
                jnp.sum(e, axis=1, keepdims=True), approx=True)       # softmax over T
            feat = jnp.einsum(
                "bst,bth->bsh", soft[:, None, :], os_,
                preferred_element_type=jnp.float32)[:, 0, :]          # (Bp, Hp)
        else:
            feat = h                                                  # final hidden
        out_ref[...] = (
            jnp.dot(feat, wcls_ref[...], preferred_element_type=jnp.float32)
            + bcls_ref[...]
        )


# ----------------------------------------------------------------------------
# Wrapper: pads to (8,128)-friendly shapes, builds the T-chunked grid.
# ----------------------------------------------------------------------------
def lstm_attention_forward(x_bte, params, *, use_attention: bool, t_chunk=None):
    """x_bte: (B, T, E) float32 (PyTorch batch_first layout). Returns (B, D_out)."""
    B, T, E = x_bte.shape
    w_ih, w_hh, b, w_cls, b_cls = params
    H = w_hh.shape[0]
    D_out = w_cls.shape[1]

    Bp = _round_up(B, 8)      # sublane alignment
    Hp = _round_up(H, 128)    # lane alignment -> every gate slice is a full 128 block

    # ---- pad parameters once (zeros keep padded h/c lanes exactly zero forever) ----
    def pad_gate_cols(w):     # (rows, 4H) -> (rows, 4Hp), each gate lane-aligned
        rows = w.shape[0]
        w4 = w.reshape(rows, 4, H)
        return (jnp.zeros((rows, 4, Hp), w.dtype).at[:, :, :H].set(w4)
                .reshape(rows, 4 * Hp))

    w_ih_p = pad_gate_cols(w_ih)                                              # (E, 4Hp)
    w_hh_p = jnp.zeros((Hp, 4 * Hp), w_hh.dtype).at[:H, :].set(pad_gate_cols(w_hh))
    b_p = pad_gate_cols(b)                                                    # (1, 4Hp)
    w_cls_p = jnp.zeros((Hp, D_out), w_cls.dtype).at[:H, :].set(w_cls)        # (Hp, Do)

    # time-major + batch padded to a sublane multiple (single fused wrapper pass)
    x_tbe = (jnp.zeros((T, Bp, E), x_bte.dtype)
             .at[:, :B, :].set(jnp.transpose(x_bte, (1, 0, 2))))

    if t_chunk is None or T % t_chunk != 0:
        t_chunk = max(d for d in range(1, min(T, 8) + 1) if T % d == 0)
    n_chunks = T // t_chunk

    # explicit VMEM budget (v7x-aware): resident weights + seq scratch + 2x-buffered
    # x chunks + projection temporaries, with 2x headroom, capped at 64 MiB.
    vmem_est = 4 * (
        2 * t_chunk * Bp * E
        + E * 4 * Hp + Hp * 4 * Hp + 4 * Hp + Hp * D_out + D_out
        + T * Bp * Hp + 2 * Bp * Hp + Bp * D_out
        + 2 * t_chunk * Bp * 4 * Hp
    )
    vmem_limit = int(min(max(2 * vmem_est, 4 * 1024 * 1024), 64 * 1024 * 1024))

    kernel = functools.partial(_lstm_attention_kernel, use_attention=use_attention)
    out_padded = pl.pallas_call(
        kernel,
        out_shape=jax.ShapeDtypeStruct((Bp, D_out), jnp.float32),
        grid_spec=pltpu.PrefetchScalarGridSpec(
            num_scalar_prefetch=0,
            grid=(n_chunks,),
            in_specs=[
                pl.BlockSpec((t_chunk, Bp, E), lambda t: (t, 0, 0)),   # pipelined x
                pl.BlockSpec((E, 4 * Hp), lambda t: (0, 0)),           # resident
                pl.BlockSpec((Hp, 4 * Hp), lambda t: (0, 0)),          # resident
                pl.BlockSpec((1, 4 * Hp), lambda t: (0, 0)),           # resident
                pl.BlockSpec((Hp, D_out), lambda t: (0, 0)),           # resident
                pl.BlockSpec((1, D_out), lambda t: (0, 0)),            # resident
            ],
            out_specs=pl.BlockSpec((Bp, D_out), lambda t: (0, 0)),
            scratch_shapes=[
                pltpu.VMEM((T, Bp, Hp), jnp.float32),   # full LSTM output sequence
                pltpu.VMEM((Bp, Hp), jnp.float32),      # h carry
                pltpu.VMEM((Bp, Hp), jnp.float32),      # c carry
            ],
        ),
        compiler_params=pltpu.CompilerParams(
            dimension_semantics=("arbitrary",),          # sequential recurrence over T
            vmem_limit_bytes=vmem_limit,
        ),
    )(x_tbe, w_ih_p, w_hh_p, b_p, w_cls_p, b_cls)
    return out_padded[:B]


# ----------------------------------------------------------------------------
# Pure-JAX reference (mirrors the PyTorch module) for a correctness check
# ----------------------------------------------------------------------------
def reference_forward(x_bte, params, *, use_attention: bool):
    w_ih, w_hh, b, w_cls, b_cls = params
    B, T, E = x_bte.shape
    H = w_hh.shape[0]

    def step(carry, x_t):
        h, c = carry
        gates = x_t @ w_ih + h @ w_hh + b[0]
        i_g = jax.nn.sigmoid(gates[:, 0 * H:1 * H])
        f_g = jax.nn.sigmoid(gates[:, 1 * H:2 * H])
        g_g = jnp.tanh(gates[:, 2 * H:3 * H])
        o_g = jax.nn.sigmoid(gates[:, 3 * H:4 * H])
        c_new = f_g * c + i_g * g_g
        h_new = o_g * jnp.tanh(c_new)
        return (h_new, c_new), h_new

    (h_final, _), out_seq = lax.scan(
        step,
        (jnp.zeros((B, H), jnp.float32), jnp.zeros((B, H), jnp.float32)),
        jnp.transpose(x_bte, (1, 0, 2)),
    )
    lstm_out = jnp.transpose(out_seq, (1, 0, 2))        # (B, T, H)

    if use_attention:
        attn = jnp.einsum("bth,bh->bt", lstm_out, h_final)
        soft = jax.nn.softmax(attn, axis=1)
        feat = jnp.einsum("bth,bt->bh", lstm_out, soft)
    else:
        feat = h_final
    return feat @ w_cls + b_cls[0]


# ----------------------------------------------------------------------------
# Main
# ----------------------------------------------------------------------------
if __name__ == "__main__":
    B, T, E, H, D_out = 2, 8, 16, 32, 4

    key = jax.random.PRNGKey(0)
    k_x, k1, k2, k3, k4, k5, k6 = jax.random.split(key, 7)

    bound = 1.0 / jnp.sqrt(jnp.float32(H))  # PyTorch LSTM default init scale
    x = jax.random.normal(k_x, (B, T, E), jnp.float32)

    # nn.LSTM(embedding_length, hidden_size), gate order [i, f, g, o], stored transposed.
    w_ih = jax.random.uniform(k1, (E, 4 * H), jnp.float32, -bound, bound)
    w_hh = jax.random.uniform(k2, (H, 4 * H), jnp.float32, -bound, bound)
    b_ih = jax.random.uniform(k3, (4 * H,), jnp.float32, -bound, bound)
    b_hh = jax.random.uniform(k4, (4 * H,), jnp.float32, -bound, bound)
    b = (b_ih + b_hh).reshape(1, 4 * H)

    # nn.Linear(hidden_size, D_out)
    w_cls = jax.random.uniform(k5, (H, D_out), jnp.float32, -bound, bound)
    b_cls = jax.random.uniform(k6, (D_out,), jnp.float32, -bound, bound).reshape(1, D_out)

    params = (w_ih, w_hh, b, w_cls, b_cls)

    ok = True
    for use_attention in (False, True):
        out = lstm_attention_forward(x, params, use_attention=use_attention, t_chunk=4)
        out = jax.block_until_ready(out)
        ref = reference_forward(x, params, use_attention=use_attention)
        if not jnp.allclose(out, ref, rtol=5e-3, atol=5e-3):
            ok = False
            print(f"MISMATCH (use_attention={use_attention}): "
                  f"max abs err = {float(jnp.max(jnp.abs(out - ref)))}")

    # TODO(synk): pack_padded_sequence / seq_lens masking path is not implemented (the
    # original module's packed branch also references undefined names).
    if ok:
        print("KERNEL_OK")
</pallas_src>

<mosaic_0001>
module attributes {stable_mosaic.version = 11 : i64} {
  func.func @_lstm_attention_kernel(%arg0: i32, %arg1: memref<4x8x16xf32, #tpu.memory_space<vmem>>, %arg2: memref<16x512xf32, #tpu.memory_space<vmem>>, %arg3: memref<128x512xf32, #tpu.memory_space<vmem>>, %arg4: memref<1x512xf32, #tpu.memory_space<vmem>>, %arg5: memref<128x4xf32, #tpu.memory_space<vmem>>, %arg6: memref<1x4xf32, #tpu.memory_space<vmem>>, %arg7: memref<8x4xf32, #tpu.memory_space<vmem>>, %arg8: memref<8x8x128xf32, #tpu.memory_space<vmem>>, %arg9: memref<8x128xf32, #tpu.memory_space<vmem>>, %arg10: memref<8x128xf32, #tpu.memory_space<vmem>>) attributes {dimension_semantics = [#tpu.dimension_semantics<arbitrary>], iteration_bounds = array<i64: 2>, scalar_prefetch = 0 : i64, scratch_operands = 3 : i64, tpu.core_type = #tpu.core_type<tc>, window_params = [{transform_indices = @transform_0, window_bounds = array<i64: 4, 8, 16>}, {pipeline_mode = #tpu.pipeline_mode<synchronous>, transform_indices = @transform_1, window_bounds = array<i64: 16, 512>}, {pipeline_mode = #tpu.pipeline_mode<synchronous>, transform_indices = @transform_2, window_bounds = array<i64: 128, 512>}, {pipeline_mode = #tpu.pipeline_mode<synchronous>, transform_indices = @transform_3, window_bounds = array<i64: 1, 512>}, {pipeline_mode = #tpu.pipeline_mode<synchronous>, transform_indices = @transform_4, window_bounds = array<i64: 128, 4>}, {pipeline_mode = #tpu.pipeline_mode<synchronous>, transform_indices = @transform_5, window_bounds = array<i64: 1, 4>}, {pipeline_mode = #tpu.pipeline_mode<synchronous>, transform_indices = @transform_6, window_bounds = array<i64: 8, 4>}]} {
    %c0_i32 = arith.constant 0 : i32
    %0 = arith.cmpi eq, %arg0, %c0_i32 : i32
    %1 = arith.extui %0 : i1 to i32
    %c0_i32_0 = arith.constant 0 : i32
    %2 = arith.cmpi ne, %1, %c0_i32_0 : i32
    scf.if %2 {
      %cst_44 = arith.constant 0.000000e+00 : f32
      %151 = vector.broadcast %cst_44 : f32 to vector<8x128xf32>
      %c0_45 = arith.constant 0 : index
      %c0_46 = arith.constant 0 : index
      %152 = vector.load %arg9[%c0_45, %c0_46] : memref<8x128xf32, #tpu.memory_space<vmem>>, vector<8x128xf32>
      tpu.vector_store %arg9[%c0_45, %c0_46], %151 {strides = array<i32>} : memref<8x128xf32, #tpu.memory_space<vmem>>, vector<8x128xf32>,
      %cst_47 = arith.constant 0.000000e+00 : f32
      %153 = vector.broadcast %cst_47 : f32 to vector<8x128xf32>
      %c0_48 = arith.constant 0 : index
      %c0_49 = arith.constant 0 : index
      %154 = vector.load %arg10[%c0_48, %c0_49] : memref<8x128xf32, #tpu.memory_space<vmem>>, vector<8x128xf32>
      tpu.vector_store %arg10[%c0_48, %c0_49], %153 {strides = array<i32>} : memref<8x128xf32, #tpu.memory_space<vmem>>, vector<8x128xf32>,
    } else {
    }
    %c0 = arith.constant 0 : index
    %c0_1 = arith.constant 0 : index
    %c0_2 = arith.constant 0 : index
    %3 = vector.load %arg1[%c0, %c0_1, %c0_2] : memref<4x8x16xf32, #tpu.memory_space<vmem>>, vector<4x8x16xf32>
    %4 = vector.shape_cast %3 : vector<4x8x16xf32> to vector<32x16xf32>
    %c0_3 = arith.constant 0 : index
    %c0_4 = arith.constant 0 : index
    %5 = vector.load %arg2[%c0_3, %c0_4] : memref<16x512xf32, #tpu.memory_space<vmem>>, vector<16x512xf32>
    %cst = arith.constant dense<0.000000e+00> : vector<32x512xf32>
    %6 = tpu.matmul %4, %5, %cst {dimension_numbers = #tpu.dot_dimension_numbers<[1], [0], [0], [1], [0, 0, 1, 1], [], []>} : vector<32x16xf32>, vector<16x512xf32>, vector<32x512xf32> -> vector<32x512xf32>
    %c0_5 = arith.constant 0 : index
    %c0_6 = arith.constant 0 : index
    %7 = vector.load %arg4[%c0_5, %c0_6] : memref<1x512xf32, #tpu.memory_space<vmem>>, vector<1x512xf32>
    %8 = vector.broadcast %7 : vector<1x512xf32> to vector<32x512xf32>
    %9 = arith.addf %6, %8 : vector<32x512xf32>
    %c0_7 = arith.constant 0 : index
    %c0_8 = arith.constant 0 : index
    %10 = vector.load %arg3[%c0_7, %c0_8] : memref<128x512xf32, #tpu.memory_space<vmem>>, vector<128x512xf32>
    %c0_9 = arith.constant 0 : index
    %c0_10 = arith.constant 0 : index
    %11 = vector.load %arg9[%c0_9, %c0_10] : memref<8x128xf32, #tpu.memory_space<vmem>>, vector<8x128xf32>
    %c0_11 = arith.constant 0 : index
    %c0_12 = arith.constant 0 : index
    %12 = vector.load %arg10[%c0_11, %c0_12] : memref<8x128xf32, #tpu.memory_space<vmem>>, vector<8x128xf32>
    %c4_i32 = arith.constant 4 : i32
    %13 = arith.muli %arg0, %c4_i32 : i32
    %14 = vector.extract_strided_slice %9 {offsets = [0, 0], sizes = [8, 512], strides = [1, 1]} : vector<32x512xf32> to vector<8x512xf32>
    %cst_13 = arith.constant dense<0.000000e+00> : vector<8x512xf32>
    %15 = tpu.matmul %11, %10, %cst_13 {dimension_numbers = #tpu.dot_dimension_numbers<[1], [0], [0], [1], [0, 0, 1, 1], [], []>} : vector<8x128xf32>, vector<128x512xf32>, vector<8x512xf32> -> vector<8x512xf32>
    %16 = arith.addf %14, %15 : vector<8x512xf32>
    %17 = vector.extract_strided_slice %16 {offsets = [0, 0], sizes = [8, 128], strides = [1, 1]} : vector<8x512xf32> to vector<8x128xf32>
    %18 = arith.negf %17 : vector<8x128xf32>
    %19 = math.exp %18 : vector<8x128xf32>
    %cst_14 = arith.constant 1.000000e+00 : f32
    %20 = vector.broadcast %cst_14 : f32 to vector<8x128xf32>
    %21 = arith.addf %20, %19 : vector<8x128xf32>
    %22 = arith.divf %20, %21 : vector<8x128xf32>
    %23 = vector.extract_strided_slice %16 {offsets = [0, 128], sizes = [8, 128], strides = [1, 1]} : vector<8x512xf32> to vector<8x128xf32>
    %24 = arith.negf %23 : vector<8x128xf32>
    %25 = math.exp %24 : vector<8x128xf32>
    %cst_15 = arith.constant 1.000000e+00 : f32
    %26 = vector.broadcast %cst_15 : f32 to vector<8x128xf32>
    %27 = arith.addf %26, %25 : vector<8x128xf32>
    %28 = arith.divf %26, %27 : vector<8x128xf32>
    %29 = vector.extract_strided_slice %16 {offsets = [0, 256], sizes = [8, 128], strides = [1, 1]} : vector<8x512xf32> to vector<8x128xf32>
    %30 = math.tanh %29 : vector<8x128xf32>
    %31 = vector.extract_strided_slice %16 {offsets = [0, 384], sizes = [8, 128], strides = [1, 1]} : vector<8x512xf32> to vector<8x128xf32>
    %32 = arith.negf %31 : vector<8x128xf32>
    %33 = math.exp %32 : vector<8x128xf32>
    %cst_16 = arith.constant 1.000000e+00 : f32
    %34 = vector.broadcast %cst_16 : f32 to vector<8x128xf32>
    %35 = arith.addf %34, %33 : vector<8x128xf32>
    %36 = arith.divf %34, %35 : vector<8x128xf32>
    %37 = arith.mulf %28, %12 : vector<8x128xf32>
    %38 = arith.mulf %22, %30 : vector<8x128xf32>
    %39 = arith.addf %37, %38 : vector<8x128xf32>
    %40 = math.tanh %39 : vector<8x128xf32>
    %41 = arith.mulf %36, %40 : vector<8x128xf32>
    %c0_i32_17 = arith.constant 0 : i32
    %42 = arith.addi %13, %c0_i32_17 : i32
    %43 = arith.index_cast %42 : i32 to index
    %c0_18 = arith.constant 0 : index
    %c0_19 = arith.constant 0 : index
    %44 = vector.load %arg8[%43, %c0_18, %c0_19] : memref<8x8x128xf32, #tpu.memory_space<vmem>>, vector<1x8x128xf32>
    %45 = vector.shape_cast %44 : vector<1x8x128xf32> to vector<8x128xf32>
    %46 = vector.shape_cast %41 : vector<8x128xf32> to vector<1x8x128xf32>
    tpu.vector_store %arg8[%43, %c0_18, %c0_19], %46 {strides = array<i32>} : memref<8x8x128xf32, #tpu.memory_space<vmem>>, vector<1x8x128xf32>,
    %47 = vector.extract_strided_slice %9 {offsets = [8, 0], sizes = [8, 512], strides = [1, 1]} : vector<32x512xf32> to vector<8x512xf32>
    %cst_20 = arith.constant dense<0.000000e+00> : vector<8x512xf32>
    %48 = tpu.matmul %41, %10, %cst_20 {dimension_numbers = #tpu.dot_dimension_numbers<[1], [0], [0], [1], [0, 0, 1, 1], [], []>} : vector<8x128xf32>, vector<128x512xf32>, vector<8x512xf32> -> vector<8x512xf32>
    %49 = arith.addf %47, %48 : vector<8x512xf32>
    %50 = vector.extract_strided_slice %49 {offsets = [0, 0], sizes = [8, 128], strides = [1, 1]} : vector<8x512xf32> to vector<8x128xf32>
    %51 = arith.negf %50 : vector<8x128xf32>
    %52 = math.exp %51 : vector<8x128xf32>
    %cst_21 = arith.constant 1.000000e+00 : f32
    %53 = vector.broadcast %cst_21 : f32 to vector<8x128xf32>
    %54 = arith.addf %53, %52 : vector<8x128xf32>
    %55 = arith.divf %53, %54 : vector<8x128xf32>
    %56 = vector.extract_strided_slice %49 {offsets = [0, 128], sizes = [8, 128], strides = [1, 1]} : vector<8x512xf32> to vector<8x128xf32>
    %57 = arith.negf %56 : vector<8x128xf32>
    %58 = math.exp %57 : vector<8x128xf32>
    %cst_22 = arith.constant 1.000000e+00 : f32
    %59 = vector.broadcast %cst_22 : f32 to vector<8x128xf32>
    %60 = arith.addf %59, %58 : vector<8x128xf32>
    %61 = arith.divf %59, %60 : vector<8x128xf32>
    %62 = vector.extract_strided_slice %49 {offsets = [0, 256], sizes = [8, 128], strides = [1, 1]} : vector<8x512xf32> to vector<8x128xf32>
    %63 = math.tanh %62 : vector<8x128xf32>
    %64 = vector.extract_strided_slice %49 {offsets = [0, 384], sizes = [8, 128], strides = [1, 1]} : vector<8x512xf32> to vector<8x128xf32>
    %65 = arith.negf %64 : vector<8x128xf32>
    %66 = math.exp %65 : vector<8x128xf32>
    %cst_23 = arith.constant 1.000000e+00 : f32
    %67 = vector.broadcast %cst_23 : f32 to vector<8x128xf32>
    %68 = arith.addf %67, %66 : vector<8x128xf32>
    %69 = arith.divf %67, %68 : vector<8x128xf32>
    %70 = arith.mulf %61, %39 : vector<8x128xf32>
    %71 = arith.mulf %55, %63 : vector<8x128xf32>
    %72 = arith.addf %70, %71 : vector<8x128xf32>
    %73 = math.tanh %72 : vector<8x128xf32>
    %74 = arith.mulf %69, %73 : vector<8x128xf32>
    %c1_i32 = arith.constant 1 : i32
    %75 = arith.addi %13, %c1_i32 : i32
    %76 = arith.index_cast %75 : i32 to index
    %c0_24 = arith.constant 0 : index
    %c0_25 = arith.constant 0 : index
    %77 = vector.load %arg8[%76, %c0_24, %c0_25] : memref<8x8x128xf32, #tpu.memory_space<vmem>>, vector<1x8x128xf32>
    %78 = vector.shape_cast %77 : vector<1x8x128xf32> to vector<8x128xf32>
    %79 = vector.shape_cast %74 : vector<8x128xf32> to vector<1x8x128xf32>
    tpu.vector_store %arg8[%76, %c0_24, %c0_25], %79 {strides = array<i32>} : memref<8x8x128xf32, #tpu.memory_space<vmem>>, vector<1x8x128xf32>,
    %80 = vector.extract_strided_slice %9 {offsets = [16, 0], sizes = [8, 512], strides = [1, 1]} : vector<32x512xf32> to vector<8x512xf32>
    %cst_26 = arith.constant dense<0.000000e+00> : vector<8x512xf32>
    %81 = tpu.matmul %74, %10, %cst_26 {dimension_numbers = #tpu.dot_dimension_numbers<[1], [0], [0], [1], [0, 0, 1, 1], [], []>} : vector<8x128xf32>, vector<128x512xf32>, vector<8x512xf32> -> vector<8x512xf32>
    %82 = arith.addf %80, %81 : vector<8x512xf32>
    %83 = vector.extract_strided_slice %82 {offsets = [0, 0], sizes = [8, 128], strides = [1, 1]} : vector<8x512xf32> to vector<8x128xf32>
    %84 = arith.negf %83 : vector<8x128xf32>
    %85 = math.exp %84 : vector<8x128xf32>
    %cst_27 = arith.constant 1.000000e+00 : f32
    %86 = vector.broadcast %cst_27 : f32 to vector<8x128xf32>
    %87 = arith.addf %86, %85 : vector<8x128xf32>
    %88 = arith.divf %86, %87 : vector<8x128xf32>
    %89 = vector.extract_strided_slice %82 {offsets = [0, 128], sizes = [8, 128], strides = [1, 1]} : vector<8x512xf32> to vector<8x128xf32>
    %90 = arith.negf %89 : vector<8x128xf32>
    %91 = math.exp %90 : vector<8x128xf32>
    %cst_28 = arith.constant 1.000000e+00 : f32
    %92 = vector.broadcast %cst_28 : f32 to vector<8x128xf32>
    %93 = arith.addf %92, %91 : vector<8x128xf32>
    %94 = arith.divf %92, %93 : vector<8x128xf32>
    %95 = vector.extract_strided_slice %82 {offsets = [0, 256], sizes = [8, 128], strides = [1, 1]} : vector<8x512xf32> to vector<8x128xf32>
    %96 = math.tanh %95 : vector<8x128xf32>
    %97 = vector.extract_strided_slice %82 {offsets = [0, 384], sizes = [8, 128], strides = [1, 1]} : vector<8x512xf32> to vector<8x128xf32>
    %98 = arith.negf %97 : vector<8x128xf32>
    %99 = math.exp %98 : vector<8x128xf32>
    %cst_29 = arith.constant 1.000000e+00 : f32
    %100 = vector.broadcast %cst_29 : f32 to vector<8x128xf32>
    %101 = arith.addf %100, %99 : vector<8x128xf32>
    %102 = arith.divf %100, %101 : vector<8x128xf32>
    %103 = arith.mulf %94, %72 : vector<8x128xf32>
    %104 = arith.mulf %88, %96 : vector<8x128xf32>
    %105 = arith.addf %103, %104 : vector<8x128xf32>
    %106 = math.tanh %105 : vector<8x128xf32>
    %107 = arith.mulf %102, %106 : vector<8x128xf32>
    %c2_i32 = arith.constant 2 : i32
    %108 = arith.addi %13, %c2_i32 : i32
    %109 = arith.index_cast %108 : i32 to index
    %c0_30 = arith.constant 0 : index
    %c0_31 = arith.constant 0 : index
    %110 = vector.load %arg8[%109, %c0_30, %c0_31] : memref<8x8x128xf32, #tpu.memory_space<vmem>>, vector<1x8x128xf32>
    %111 = vector.shape_cast %110 : vector<1x8x128xf32> to vector<8x128xf32>
    %112 = vector.shape_cast %107 : vector<8x128xf32> to vector<1x8x128xf32>
    tpu.vector_store %arg8[%109, %c0_30, %c0_31], %112 {strides = array<i32>} : memref<8x8x128xf32, #tpu.memory_space<vmem>>, vector<1x8x128xf32>,
    %113 = vector.extract_strided_slice %9 {offsets = [24, 0], sizes = [8, 512], strides = [1, 1]} : vector<32x512xf32> to vector<8x512xf32>
    %cst_32 = arith.constant dense<0.000000e+00> : vector<8x512xf32>
    %114 = tpu.matmul %107, %10, %cst_32 {dimension_numbers = #tpu.dot_dimension_numbers<[1], [0], [0], [1], [0, 0, 1, 1], [], []>} : vector<8x128xf32>, vector<128x512xf32>, vector<8x512xf32> -> vector<8x512xf32>
    %115 = arith.addf %113, %114 : vector<8x512xf32>
    %116 = vector.extract_strided_slice %115 {offsets = [0, 0], sizes = [8, 128], strides = [1, 1]} : vector<8x512xf32> to vector<8x128xf32>
    %117 = arith.negf %116 : vector<8x128xf32>
    %118 = math.exp %117 : vector<8x128xf32>
    %cst_33 = arith.constant 1.000000e+00 : f32
    %119 = vector.broadcast %cst_33 : f32 to vector<8x128xf32>
    %120 = arith.addf %119, %118 : vector<8x128xf32>
    %121 = arith.divf %119, %120 : vector<8x128xf32>
    %122 = vector.extract_strided_slice %115 {offsets = [0, 128], sizes = [8, 128], strides = [1, 1]} : vector<8x512xf32> to vector<8x128xf32>
    %123 = arith.negf %122 : vector<8x128xf32>
    %124 = math.exp %123 : vector<8x128xf32>
    %cst_34 = arith.constant 1.000000e+00 : f32
    %125 = vector.broadcast %cst_34 : f32 to vector<8x128xf32>
    %126 = arith.addf %125, %124 : vector<8x128xf32>
    %127 = arith.divf %125, %126 : vector<8x128xf32>
    %128 = vector.extract_strided_slice %115 {offsets = [0, 256], sizes = [8, 128], strides = [1, 1]} : vector<8x512xf32> to vector<8x128xf32>
    %129 = math.tanh %128 : vector<8x128xf32>
    %130 = vector.extract_strided_slice %115 {offsets = [0, 384], sizes = [8, 128], strides = [1, 1]} : vector<8x512xf32> to vector<8x128xf32>
    %131 = arith.negf %130 : vector<8x128xf32>
    %132 = math.exp %131 : vector<8x128xf32>
    %cst_35 = arith.constant 1.000000e+00 : f32
    %133 = vector.broadcast %cst_35 : f32 to vector<8x128xf32>
    %134 = arith.addf %133, %132 : vector<8x128xf32>
    %135 = arith.divf %133, %134 : vector<8x128xf32>
    %136 = arith.mulf %127, %105 : vector<8x128xf32>
    %137 = arith.mulf %121, %129 : vector<8x128xf32>
    %138 = arith.addf %136, %137 : vector<8x128xf32>
    %139 = math.tanh %138 : vector<8x128xf32>
    %140 = arith.mulf %135, %139 : vector<8x128xf32>
    %c3_i32 = arith.constant 3 : i32
    %141 = arith.addi %13, %c3_i32 : i32
    %142 = arith.index_cast %141 : i32 to index
    %c0_36 = arith.constant 0 : index
    %c0_37 = arith.constant 0 : index
    %143 = vector.load %arg8[%142, %c0_36, %c0_37] : memref<8x8x128xf32, #tpu.memory_space<vmem>>, vector<1x8x128xf32>
    %144 = vector.shape_cast %143 : vector<1x8x128xf32> to vector<8x128xf32>
    %145 = vector.shape_cast %140 : vector<8x128xf32> to vector<1x8x128xf32>
    tpu.vector_store %arg8[%142, %c0_36, %c0_37], %145 {strides = array<i32>} : memref<8x8x128xf32, #tpu.memory_space<vmem>>, vector<1x8x128xf32>,
    %c0_38 = arith.constant 0 : index
    %c0_39 = arith.constant 0 : index
    %146 = vector.load %arg9[%c0_38, %c0_39] : memref<8x128xf32, #tpu.memory_space<vmem>>, vector<8x128xf32>
    tpu.vector_store %arg9[%c0_38, %c0_39], %140 {strides = array<i32>} : memref<8x128xf32, #tpu.memory_space<vmem>>, vector<8x128xf32>,
    %c0_40 = arith.constant 0 : index
    %c0_41 = arith.constant 0 : index
    %147 = vector.load %arg10[%c0_40, %c0_41] : memref<8x128xf32, #tpu.memory_space<vmem>>, vector<8x128xf32>
    tpu.vector_store %arg10[%c0_40, %c0_41], %138 {strides = array<i32>} : memref<8x128xf32, #tpu.memory_space<vmem>>, vector<8x128xf32>,
    %c1_i32_42 = arith.constant 1 : i32
    %148 = arith.cmpi eq, %arg0, %c1_i32_42 : i32
    %149 = arith.extui %148 : i1 to i32
    %c0_i32_43 = arith.constant 0 : i32
    %150 = arith.cmpi ne, %149, %c0_i32_43 : i32
    scf.if %150 {
      %c0_44 = arith.constant 0 : index
      %c0_45 = arith.constant 0 : index
      %151 = vector.load %arg5[%c0_44, %c0_45] : memref<128x4xf32, #tpu.memory_space<vmem>>, vector<128x4xf32>
      %cst_46 = arith.constant dense<0.000000e+00> : vector<8x4xf32>
      %152 = tpu.matmul %140, %151, %cst_46 {dimension_numbers = #tpu.dot_dimension_numbers<[1], [0], [0], [1], [0, 0, 1, 1], [], []>} : vector<8x128xf32>, vector<128x4xf32>, vector<8x4xf32> -> vector<8x4xf32>
      %c0_47 = arith.constant 0 : index
      %c0_48 = arith.constant 0 : index
      %153 = vector.load %arg6[%c0_47, %c0_48] : memref<1x4xf32, #tpu.memory_space<vmem>>, vector<1x4xf32>
      %154 = vector.broadcast %153 : vector<1x4xf32> to vector<8x4xf32>
      %155 = arith.addf %152, %154 : vector<8x4xf32>
      %c0_49 = arith.constant 0 : index
      %c0_50 = arith.constant 0 : index
      %156 = vector.load %arg7[%c0_49, %c0_50] : memref<8x4xf32, #tpu.memory_space<vmem>>, vector<8x4xf32>
      tpu.vector_store %arg7[%c0_49, %c0_50], %155 {strides = array<i32>} : memref<8x4xf32, #tpu.memory_space<vmem>>, vector<8x4xf32>,
    } else {
    }
    return
  }
  func.func @transform_0(%arg0: i32) -> (i32, i32, i32) {
    %c0_i32 = arith.constant 0 : i32
    %c0_i32_0 = arith.constant 0 : i32
    %c0_i32_1 = arith.constant 0 : i32
    return %arg0, %c0_i32, %c0_i32_0 : i32, i32, i32
  }
  func.func @transform_1(%arg0: i32) -> (i32, i32) {
    %c0_i32 = arith.constant 0 : i32
    %c0_i32_0 = arith.constant 0 : i32
    %c0_i32_1 = arith.constant 0 : i32
    return %c0_i32, %c0_i32_0 : i32, i32
  }
  func.func @transform_2(%arg0: i32) -> (i32, i32) {
    %c0_i32 = arith.constant 0 : i32
    %c0_i32_0 = arith.constant 0 : i32
    %c0_i32_1 = arith.constant 0 : i32
    return %c0_i32, %c0_i32_0 : i32, i32
  }
  func.func @transform_3(%arg0: i32) -> (i32, i32) {
    %c0_i32 = arith.constant 0 : i32
    %c0_i32_0 = arith.constant 0 : i32
    %c0_i32_1 = arith.constant 0 : i32
    return %c0_i32, %c0_i32_0 : i32, i32
  }
  func.func @transform_4(%arg0: i32) -> (i32, i32) {
    %c0_i32 = arith.constant 0 : i32
    %c0_i32_0 = arith.constant 0 : i32
    %c0_i32_1 = arith.constant 0 : i32
    return %c0_i32, %c0_i32_0 : i32, i32
  }
  func.func @transform_5(%arg0: i32) -> (i32, i32) {
    %c0_i32 = arith.constant 0 : i32
    %c0_i32_0 = arith.constant 0 : i32
    %c0_i32_1 = arith.constant 0 : i32
    return %c0_i32, %c0_i32_0 : i32, i32
  }
  func.func @transform_6(%arg0: i32) -> (i32, i32) {
    %c0_i32 = arith.constant 0 : i32
    %c0_i32_0 = arith.constant 0 : i32
    %c0_i32_1 = arith.constant 0 : i32
    return %c0_i32, %c0_i32_0 : i32, i32
  }
}

</mosaic_0001>

<bundles_post_ra>
// kernel: tpu_custom_call.1
= control target key start
LH: loop header
LB: loop body
LE: loop exit
PB: predicated region body
PF: predicated region fallthrough
CT: control target
= control target key end

     0   :  { %11 = vsyncpa [#allocation6], 0  ;;  %s1408_s21 = smov 0   ;;  %s1968_s0 = inlined_call_operand.vmem [shape: f32[8,8,16], index: 0, kind: input, shape index: {}]   ;;  %s1969_s1 = inlined_call_operand.vmem [shape: f32[16,512], index: 1, kind: input, shape index: {}]   ;;  %s1970_s2 = inlined_call_operand.hbm [shape: f32[128,512], index: 2, kind: input, shape index: {}]   ;;  %s1971_s3 = inlined_call_operand.vmem [shape: f32[1,512], index: 3, kind: input, shape index: {}]   ;;  %s1972_s4 = inlined_call_operand.vmem [shape: f32[128,4], index: 4, kind: input, shape index: {}]   ;;  %s1973_s5 = inlined_call_operand.vmem [shape: f32[1,4], index: 5, kind: input, shape index: {}]   ;;  %s1974_s6 = inlined_call_operand.vmem [shape: f32[8,4], index: 6, kind: output, shape index: {}]  }
   0x1 LB: > { %s188_s24 = sshll.u32 %s1970_s2, 4  ;;  %s1417_s25 = sadd.s32 4294967295, %s1367_s21   ;;  %s1367_s21 = sphi %s1408_s21, %s17_s21   ;;  %s189_s24 = int_to_ptr.hbm [resolvable:$true] %s188_s24 }
   0x2   : > { %p1186_p0 = scmp.ge.s32.totalorder %s1367_s21, 1  ;;  %p174_p1 = scmp.lt.s32.totalorder %s1367_s21, 3 }
   0x3   : > { %p1187_p2 = scmp.ne.s32.totalorder %s1417_s25, 0  ;;  %p1248_p3 = scmp.eq.s32.totalorder %s1417_s25, 0 }
   0x4   : > { %p175_p4 = pnand %p1186_p0, %p174_p1  ;;  %s1369_s26 = smov [#allocation5]  }
   0x5   : > { %s190_s27 = sshll.u32 %s1369_s26, 4  ;;  %s1370_s28 = smov 512   ;;  %s191_s27 = int_to_ptr.vmem [resolvable:$true] %s190_s27 }
   0x6   : > { %p1244_p5 = pneg %p175_p4  ;;  %s1371_s29 = smov 32  }
   0x7   : > { %224 = sbr.rel (%p175_p4) target bundleno = 909 (0x38d), region = 44 }
   0x8   : > { %p1245_p6 = pnand %p1248_p3, %p1244_p5 }
   0xa   : > { %1247 = dma.hbm_to_vmem [thread:$0]  (!%p1245_p6), %s189_s24, 8192, %s191_s27, [#allocation6], %s1370_s28, %s1370_s28, %s1371_s29  }
   0xc   : > { %1362 = dma.done.wait (%p1248_p3), [#allocation6], 8192  }
   0xd   : > { %1364 = vsyncadd (%p1248_p3), [#allocation6], 4294959104  ;;  %s1191_s30 = sshll.u32 %s1417_s25, 2 }
   0xe   : > { %p251_p7 = scmp.lt.s32.totalorder %s1191_s30, 7  ;;  %259 = sbr.rel (%p1187_p2) target bundleno = 22 (0x16), region = 52 }
  0x10   : > { %s2081_s30 = smov (!%p251_p7, %s1191_s30), 7 }
  0x11   : > { %s1192_s7 = sshll.u32 %s2081_s30, 3 }
  0x12   : > { %s1427_s10 = scalar_lea.vmem %s1968_s0, %s1192_s7 }
  0x13   : > { %v1372_v0 = vmov 0.0  }
  0x14   : > { %260 = vst [vmem:[#allocation3] sm:$0xff] %v1372_v0 }
  0x15   : > { %261 = vst [vmem:[#allocation4] sm:$0xff] %v1372_v0 }
  0x16 PF: > { %v270_v1 = vld [vmem:[%s1969_s1 + $0x20] sm:$0xff]  ;;  %v271_v2 = vld [vmem:[%s1969_s1 + $0x28] sm:$0xff]  ;;  %v272_v3 = vld [vmem:[%s1969_s1 + $0x30] sm:$0xff]  ;;  %vm284_vm0 = vcmask 130048   ;;  %p1233_p8 = scmp.ne.s32.totalorder %s1417_s25, 1 }
  0x17   : > { %311 = vmatpush.msra.mxu0 %v270_v1  ;;  %340 = vmatpush.msra.mxu1 %v271_v2  ;;  %v273_v4 = vld [vmem:[%s1969_s1 + $0x38] sm:$0xff]  ;;  %v266_v5 = vld [vmem:[%s1969_s1] sm:$0xff]  ;;  %v267_v6 = vld [vmem:[%s1969_s1 + $0x8] sm:$0xff] }
  0x18   : > { %369 = vmatpush.msra.mxu2 %v272_v3  ;;  %398 = vmatpush.msra.mxu3 %v273_v4  ;;  %v268_v7 = vld [vmem:[%s1969_s1 + $0x10] sm:$0xff]  ;;  %v269_v8 = vld [vmem:[%s1969_s1 + $0x18] sm:$0xff]  ;;  %v262_v9 = vld [vmem:[%s1427_s10] sm:$0xff] }
  0x19   : > { %312 = vmatpush.msra.mxu0 %v266_v5  ;;  %341 = vmatpush.msra.mxu1 %v267_v6  ;;  %v1456_v10 = vld [vmem:[#allocation5 + $0x1e0] sm:$0xff]  ;;  %v1458_v11 = vld [vmem:[#allocation5 + $0x1e8] sm:$0xff]  ;;  %v1462_v12 = vld [vmem:[#allocation5 + $0x1f0] sm:$0xff] }
  0x1a   : > { %370 = vmatpush.msra.mxu2 %v268_v7  ;;  %399 = vmatpush.msra.mxu3 %v269_v8  ;;  %v1464_v13 = vld [vmem:[#allocation5 + $0x1f8] sm:$0xff]  ;;  %v1468_v14 = vld [vmem:[#allocation5 + $0x1c0] sm:$0xff]  ;;  %v1470_v15 = vld [vmem:[#allocation5 + $0x1c8] sm:$0xff] }
  0x1b   : > { %1194 = vmatmul.msk.f32.vlgmr.msra.gmra.mxu0 %vm284_vm0, %v262_v9  ;;  %1198 = vmatmul.msk.f32.vlgmr.msra.gmra.mxu1 %vm284_vm0, %v262_v9  ;;  %v1474_v16 = vld [vmem:[#allocation5 + $0x1d0] sm:$0xff]  ;;  %v1476_v17 = vld [vmem:[#allocation5 + $0x1d8] sm:$0xff]  ;;  %v1480_v18 = vld [vmem:[#allocation5 + $0x1a0] sm:$0xff] }
  0x1c   : > { %1202 = vmatmul.msk.f32.vlgmr.msra.gmra.mxu2 %vm284_vm0, %v262_v9  ;;  %1206 = vmatmul.msk.f32.vlgmr.msra.gmra.mxu3 %vm284_vm0, %v262_v9  ;;  %v1482_v19 = vld [vmem:[#allocation5 + $0x1a8] sm:$0xff]  ;;  %v1486_v20 = vld [vmem:[#allocation5 + $0x1b0] sm:$0xff]  ;;  %v1488_v21 = vld [vmem:[#allocation5 + $0x1b8] sm:$0xff] }
  0x1d   : > { %480 = vmatpush.msrb.mxu0 %v1456_v10  ;;  %500 = vmatpush.msrb.mxu1 %v1458_v11  ;;  %v1492_v22 = vld [vmem:[#allocation5 + $0x180] sm:$0xff]  ;;  %v1494_v23 = vld [vmem:[#allocation5 + $0x188] sm:$0xff]  ;;  %v1498_v24 = vld [vmem:[#allocation5 + $0x190] sm:$0xff] }
  0x1e   : > { %520 = vmatpush.msrb.mxu2 %v1462_v12  ;;  %540 = vmatpush.msrb.mxu3 %v1464_v13  ;;  %v1500_v25 = vld [vmem:[#allocation5 + $0x198] sm:$0xff]  ;;  %v1509_v27 = vld [vmem:[#allocation5 + $0x160] sm:$0xff]  ;;  %v1511_v28 = vld [vmem:[#allocation5 + $0x168] sm:$0xff] }
  0x1f   : > { %481 = vmatpush.msrb.mxu0 %v1468_v14  ;;  %501 = vmatpush.msrb.mxu1 %v1470_v15  ;;  %v263_v26 = vld [vmem:[%s1427_s10 + $0x8] sm:$0xff]  ;;  %v1515_v29 = vld [vmem:[#allocation5 + $0x170] sm:$0xff]  ;;  %v1521_v31 = vld [vmem:[#allocation5 + $0x140] sm:$0xff] }
  0x20   : > { %521 = vmatpush.msrb.mxu2 %v1474_v16  ;;  %541 = vmatpush.msrb.mxu3 %v1476_v17  ;;  %v1517_v30 = vld [vmem:[#allocation5 + $0x178] sm:$0xff]  ;;  %v1523_v32 = vld [vmem:[#allocation5 + $0x148] sm:$0xff]  ;;  %v1527_v33 = vld [vmem:[#allocation5 + $0x150] sm:$0xff] }
  0x21   : > { %482 = vmatpush.msrb.mxu0 %v1480_v18  ;;  %502 = vmatpush.msrb.mxu1 %v1482_v19  ;;  %v1529_v34 = vld [vmem:[#allocation5 + $0x158] sm:$0xff]  ;;  %v1533_v35 = vld [vmem:[#allocation5 + $0x120] sm:$0xff]  ;;  %v1535_v36 = vld [vmem:[#allocation5 + $0x128] sm:$0xff] }
  0x22   : > { %522 = vmatpush.msrb.mxu2 %v1486_v20  ;;  %542 = vmatpush.msrb.mxu3 %v1488_v21  ;;  %v1539_v37 = vld [vmem:[#allocation5 + $0x130] sm:$0xff]  ;;  %v1541_v38 = vld [vmem:[#allocation5 + $0x138] sm:$0xff]  ;;  %v1545_v39 = vld [vmem:[#allocation5 + $0x100] sm:$0xff] }
  0x23   : > { %483 = vmatpush.msrb.mxu0 %v1492_v22  ;;  %503 = vmatpush.msrb.mxu1 %v1494_v23  ;;  %v1547_v40 = vld [vmem:[#allocation5 + $0x108] sm:$0xff]  ;;  %v1551_v41 = vld [vmem:[#allocation5 + $0x110] sm:$0xff]  ;;  %v1553_v42 = vld [vmem:[#allocation5 + $0x118] sm:$0xff] }
  0x24   : > { %523 = vmatpush.msrb.mxu2 %v1498_v24  ;;  %543 = vmatpush.msrb.mxu3 %v1500_v25  ;;  %v264_v43 = vld [vmem:[%s1427_s10 + $0x10] sm:$0xff]  ;;  %v1564_v45 = vld [vmem:[#allocation5 + $0xe8] sm:$0xff]  ;;  %v1568_v46 = vld [vmem:[#allocation5 + $0xf0] sm:$0xff] }
  0x25   : > { %1195 = vmatmul.msk.f32.gmra.mxu0 %vm284_vm0, %v263_v26  ;;  %1199 = vmatmul.msk.f32.gmra.mxu1 %vm284_vm0, %v263_v26  ;;  %v1562_v44 = vld [vmem:[#allocation5 + $0xe0] sm:$0xff]  ;;  %v1570_v47 = vld [vmem:[#allocation5 + $0xf8] sm:$0xff]  ;;  %v1576_v49 = vld [vmem:[#allocation5 + $0xc8] sm:$0xff] }
  0x26   : > { %1203 = vmatmul.msk.f32.gmra.mxu2 %vm284_vm0, %v263_v26  ;;  %1207 = vmatmul.msk.f32.gmra.mxu3 %vm284_vm0, %v263_v26  ;;  %v1574_v48 = vld [vmem:[#allocation5 + $0xc0] sm:$0xff]  ;;  %v1580_v50 = vld [vmem:[#allocation5 + $0xd0] sm:$0xff]  ;;  %v1582_v51 = vld [vmem:[#allocation5 + $0xd8] sm:$0xff] }
  0x27   : > { %484 = vmatpush.msrb.mxu0 %v1509_v27  ;;  %504 = vmatpush.msrb.mxu1 %v1511_v28  ;;  %2003 = vst [vmem:[#allocation8_spill] sm:$0xff] %v1580_v50  ;;  %v1586_v52 = vld [vmem:[#allocation5 + $0xa0] sm:$0xff]  ;;  %v1588_v53 = vld [vmem:[#allocation5 + $0xa8] sm:$0xff]  ;;  %v1592_v54 = vld [vmem:[#allocation5 + $0xb0] sm:$0xff] }
  0x28   : > { %524 = vmatpush.msrb.mxu2 %v1515_v29  ;;  %544 = vmatpush.msrb.mxu3 %v1517_v30  ;;  %2004 = vst [vmem:[#allocation9_spill] sm:$0xff] %v1582_v51  ;;  %v1594_v55 = vld [vmem:[#allocation5 + $0xb8] sm:$0xff]  ;;  %v1598_v56 = vld [vmem:[#allocation5 + $0x80] sm:$0xff]  ;;  %v1600_v57 = vld [vmem:[#allocation5 + $0x88] sm:$0xff] }
  0x29   : > { %485 = vmatpush.msrb.mxu0 %v1521_v31  ;;  %505 = vmatpush.msrb.mxu1 %v1523_v32  ;;  %2005 = vst [vmem:[#allocation10_spill] sm:$0xff] %v1586_v52  ;;  %v1604_v58 = vld [vmem:[#allocation5 + $0x90] sm:$0xff]  ;;  %v1606_v59 = vld [vmem:[#allocation5 + $0x98] sm:$0xff]  ;;  %v265_v60 = vld [vmem:[%s1427_s10 + $0x18] sm:$0xff] }
  0x2a   : > { %525 = vmatpush.msrb.mxu2 %v1527_v33  ;;  %545 = vmatpush.msrb.mxu3 %v1529_v34  ;;  %2006 = vst [vmem:[#allocation11_spill] sm:$0xff] %v1588_v53  ;;  %v1615_v61 = vld [vmem:[#allocation5 + $0x60] sm:$0xff]  ;;  %v1617_v62 = vld [vmem:[#allocation5 + $0x68] sm:$0xff]  ;;  %v1621_v63 = vld [vmem:[#allocation5 + $0x70] sm:$0xff] }
  0x2b   : > { %486 = vmatpush.msrb.mxu0 %v1533_v35  ;;  %506 = vmatpush.msrb.mxu1 %v1535_v36  ;;  %2007 = vst [vmem:[#allocation12_spill] sm:$0xff] %v1592_v54  ;;  %v1623_v0 = vld [vmem:[#allocation5 + $0x78] sm:$0xff]  ;;  %v1627_v1 = vld [vmem:[#allocation5 + $0x40] sm:$0xff]  ;;  %v1629_v2 = vld [vmem:[#allocation5 + $0x48] sm:$0xff] }
  0x2c   : > { %526 = vmatpush.msrb.mxu2 %v1539_v37  ;;  %546 = vmatpush.msrb.mxu3 %v1541_v38  ;;  %2008 = vst [vmem:[#allocation13_spill] sm:$0xff] %v1594_v55  ;;  %v1633_v3 = vld [vmem:[#allocation5 + $0x50] sm:$0xff]  ;;  %v1635_v4 = vld [vmem:[#allocation5 + $0x58] sm:$0xff]  ;;  %v1639_v5 = vld [vmem:[#allocation5 + $0x20] sm:$0xff] }
  0x2d   : > { %487 = vmatpush.msrb.mxu0 %v1545_v39  ;;  %507 = vmatpush.msrb.mxu1 %v1547_v40  ;;  %2009 = vst [vmem:[#allocation14_spill] sm:$0xff] %v1598_v56  ;;  %v1641_v6 = vld [vmem:[#allocation5 + $0x28] sm:$0xff]  ;;  %v1645_v7 = vld [vmem:[#allocation5 + $0x30] sm:$0xff]  ;;  %v1647_v8 = vld [vmem:[#allocation5 + $0x38] sm:$0xff] }
  0x2e   : > { %527 = vmatpush.msrb.mxu2 %v1551_v41  ;;  %547 = vmatpush.msrb.mxu3 %v1553_v42  ;;  %2010 = vst [vmem:[#allocation15_spill] sm:$0xff] %v1600_v57  ;;  %v1651_v9 = vld [vmem:[#allocation5] sm:$0xff]  ;;  %v1653_v26 = vld [vmem:[#allocation5 + $0x8] sm:$0xff] }
  0x2f   : > { %1196 = vmatmul.msk.f32.gmra.mxu0 %vm284_vm0, %v264_v43  ;;  %1200 = vmatmul.msk.f32.gmra.mxu1 %vm284_vm0, %v264_v43  ;;  %2011 = vst [vmem:[#allocation16_spill] sm:$0xff] %v1604_v58 }
  0x30   : > { %1204 = vmatmul.msk.f32.gmra.mxu2 %vm284_vm0, %v264_v43  ;;  %1208 = vmatmul.msk.f32.gmra.mxu3 %vm284_vm0, %v264_v43  ;;  %2012 = vst [vmem:[#allocation17_spill] sm:$0xff] %v1606_v59  ;;  %v1657_v43 = vld [vmem:[#allocation5 + $0x10] sm:$0xff] }
  0x31   : > { %488 = vmatpush.msrb.mxu0 %v1562_v44  ;;  %508 = vmatpush.msrb.mxu1 %v1564_v45  ;;  %2013 = vst [vmem:[#allocation18_spill] sm:$0xff] %v1615_v61 }
  0x32   : > { %528 = vmatpush.msrb.mxu2 %v1568_v46  ;;  %548 = vmatpush.msrb.mxu3 %v1570_v47  ;;  %2014 = vst [vmem:[#allocation19_spill] sm:$0xff] %v1617_v62 }
  0x33   : > { %489 = vmatpush.msrb.mxu0 %v1574_v48  ;;  %509 = vmatpush.msrb.mxu1 %v1576_v49  ;;  %2015 = vst [vmem:[#allocation20_spill] sm:$0xff] %v1621_v63 }
  0x34   : > { %529 = vmatpush.msrb.mxu2 %v1580_v50  ;;  %549 = vmatpush.msrb.mxu3 %v1582_v51  ;;  %2016 = vst [vmem:[#allocation21_spill] sm:$0xff] %v1623_v0 }
  0x35   : > { %490 = vmatpush.msrb.mxu0 %v1586_v52  ;;  %510 = vmatpush.msrb.mxu1 %v1588_v53  ;;  %2017 = vst [vmem:[#allocation22_spill] sm:$0xff] %v1627_v1 }
  0x36   : > { %530 = vmatpush.msrb.mxu2 %v1592_v54  ;;  %550 = vmatpush.msrb.mxu3 %v1594_v55  ;;  %2018 = vst [vmem:[#allocation23_spill] sm:$0xff] %v1629_v2 }
  0x37   : > { %491 = vmatpush.msrb.mxu0 %v1598_v56  ;;  %511 = vmatpush.msrb.mxu1 %v1600_v57  ;;  %2019 = vst [vmem:[#allocation24_spill] sm:$0xff] %v1633_v3 }
  0x38   : > { %531 = vmatpush.msrb.mxu2 %v1604_v58  ;;  %551 = vmatpush.msrb.mxu3 %v1606_v59  ;;  %2020 = vst [vmem:[#allocation25_spill] sm:$0xff] %v1635_v4 }
  0x39   : > { %1197 = vmatmul.msk.f32.gmra.mxu0 %vm284_vm0, %v265_v60  ;;  %1201 = vmatmul.msk.f32.gmra.mxu1 %vm284_vm0, %v265_v60  ;;  %2021 = vst [vmem:[#allocation26_spill] sm:$0xff] %v1639_v5 }
  0x3a   : > { %1205 = vmatmul.msk.f32.gmra.mxu2 %vm284_vm0, %v265_v60  ;;  %1209 = vmatmul.msk.f32.gmra.mxu3 %vm284_vm0, %v265_v60  ;;  %2022 = vst [vmem:[#allocation27_spill] sm:$0xff] %v1641_v6  ;;  %v1659_v60 = vld [vmem:[#allocation5 + $0x18] sm:$0xff] }
  0x3b   : > { %492 = vmatpush.msrb.mxu0 %v1615_v61  ;;  %512 = vmatpush.msrb.mxu1 %v1617_v62  ;;  %2023 = vst [vmem:[#allocation28_spill] sm:$0xff] %v1645_v7 }
  0x3c   : > { %532 = vmatpush.msrb.mxu2 %v1621_v63  ;;  %552 = vmatpush.msrb.mxu3 %v1623_v0  ;;  %2024 = vst [vmem:[#allocation29_spill] sm:$0xff] %v1647_v8 }
  0x3d   : > { %493 = vmatpush.msrb.mxu0 %v1627_v1  ;;  %513 = vmatpush.msrb.mxu1 %v1629_v2  ;;  %2025 = vst [vmem:[#allocation30_spill] sm:$0xff] %v1651_v9  ;;  %v477_v2 = vld [vmem:[#allocation3] sm:$0xff] }
  0x3e   : > { %533 = vmatpush.msrb.mxu2 %v1633_v3  ;;  %553 = vmatpush.msrb.mxu3 %v1635_v4  ;;  %2026 = vst [vmem:[#allocation31_spill] sm:$0xff] %v1653_v26 }
  0x3f   : > { %494 = vmatpush.msrb.mxu0 %v1639_v5  ;;  %514 = vmatpush.msrb.mxu1 %v1641_v6  ;;  %2027 = vst [vmem:[#allocation32_spill] sm:$0xff] %v1657_v43 }
  0x40   : > { %2028 = vst [vmem:[#allocation33_spill] sm:$0xff] %v1659_v60  ;;  %534 = vmatpush.msrb.mxu2 %v1645_v7  ;;  %554 = vmatpush.msrb.mxu3 %v1647_v8 }
  0x41   : > { %495 = vmatpush.msrb.mxu0 %v1651_v9  ;;  %515 = vmatpush.msrb.mxu1 %v1653_v26 }
  0x42   : > { %535 = vmatpush.msrb.mxu2 %v1657_v43  ;;  %555 = vmatpush.msrb.mxu3 %v1659_v60 }
  0x43   : > { %496 = vmatmul.f32.vlgmr.msrb.gmra.mxu0 %v477_v2  ;;  %516 = vmatmul.f32.vlgmr.msrb.gmra.mxu1 %v477_v2 }
  0x44   : > { %536 = vmatmul.f32.vlgmr.msrb.gmra.mxu2 %v477_v2  ;;  %556 = vmatmul.f32.vlgmr.msrb.gmra.mxu3 %v477_v2  ;;  %v2029_v2 = vld [vmem:[#allocation23_spill] sm:$0xff] }
  0x45   : > { %630 = vmatpush.msra.mxu0 %v1456_v10  ;;  %650 = vmatpush.msra.mxu1 %v1458_v11 }
  0x46   : > { %670 = vmatpush.msra.mxu2 %v1462_v12  ;;  %690 = vmatpush.msra.mxu3 %v1464_v13 }
  0x47   : > { %631 = vmatpush.msra.mxu0 %v1468_v14  ;;  %651 = vmatpush.msra.mxu1 %v1470_v15 }
  0x48   : > { %671 = vmatpush.msra.mxu2 %v1474_v16  ;;  %691 = vmatpush.msra.mxu3 %v1476_v17 }
  0x49   : > { %632 = vmatpush.msra.mxu0 %v1480_v18  ;;  %652 = vmatpush.msra.mxu1 %v1482_v19 }
  0x4a   : > { %672 = vmatpush.msra.mxu2 %v1486_v20  ;;  %692 = vmatpush.msra.mxu3 %v1488_v21 }
  0x4b   : > { %633 = vmatpush.msra.mxu0 %v1492_v22  ;;  %653 = vmatpush.msra.mxu1 %v1494_v23 }
  0x4c   : > { %673 = vmatpush.msra.mxu2 %v1498_v24  ;;  %693 = vmatpush.msra.mxu3 %v1500_v25 }
  0x4d   : > { %634 = vmatpush.msra.mxu0 %v1509_v27  ;;  %654 = vmatpush.msra.mxu1 %v1511_v28 }
  0x4e   : > { %674 = vmatpush.msra.mxu2 %v1515_v29  ;;  %694 = vmatpush.msra.mxu3 %v1517_v30 }
  0x4f   : > { %635 = vmatpush.msra.mxu0 %v1521_v31  ;;  %655 = vmatpush.msra.mxu1 %v1523_v32 }
  0x50   : > { %675 = vmatpush.msra.mxu2 %v1527_v33  ;;  %695 = vmatpush.msra.mxu3 %v1529_v34 }
  0x51   : > { %636 = vmatpush.msra.mxu0 %v1533_v35  ;;  %656 = vmatpush.msra.mxu1 %v1535_v36 }
  0x52   : > { %676 = vmatpush.msra.mxu2 %v1539_v37  ;;  %696 = vmatpush.msra.mxu3 %v1541_v38 }
  0x53   : > { %637 = vmatpush.msra.mxu0 %v1545_v39  ;;  %657 = vmatpush.msra.mxu1 %v1547_v40 }
  0x54   : > { %677 = vmatpush.msra.mxu2 %v1551_v41  ;;  %697 = vmatpush.msra.mxu3 %v1553_v42 }
  0x55   : > { %638 = vmatpush.msra.mxu0 %v1562_v44  ;;  %658 = vmatpush.msra.mxu1 %v1564_v45 }
  0x56   : > { %678 = vmatpush.msra.mxu2 %v1568_v46  ;;  %698 = vmatpush.msra.mxu3 %v1570_v47 }
  0x57   : > { %639 = vmatpush.msra.mxu0 %v1574_v48  ;;  %659 = vmatpush.msra.mxu1 %v1576_v49 }
  0x58   : > { %679 = vmatpush.msra.mxu2 %v1580_v50  ;;  %699 = vmatpush.msra.mxu3 %v1582_v51 }
  0x59   : > { %640 = vmatpush.msra.mxu0 %v1586_v52  ;;  %660 = vmatpush.msra.mxu1 %v1588_v53 }
  0x5a   : > { %680 = vmatpush.msra.mxu2 %v1592_v54  ;;  %700 = vmatpush.msra.mxu3 %v1594_v55 }
  0x5b   : > { %641 = vmatpush.msra.mxu0 %v1598_v56  ;;  %661 = vmatpush.msra.mxu1 %v1600_v57 }
  0x5c   : > { %681 = vmatpush.msra.mxu2 %v1604_v58  ;;  %701 = vmatpush.msra.mxu3 %v1606_v59 }
  0x5d   : > { %642 = vmatpush.msra.mxu0 %v1615_v61  ;;  %662 = vmatpush.msra.mxu1 %v1617_v62 }
  0x5e   : > { %682 = vmatpush.msra.mxu2 %v1621_v63  ;;  %702 = vmatpush.msra.mxu3 %v1623_v0 }
  0x5f   : > { %643 = vmatpush.msra.mxu0 %v1627_v1  ;;  %663 = vmatpush.msra.mxu1 %v2029_v2 }
  0x60   : > { %683 = vmatpush.msra.mxu2 %v1633_v3  ;;  %703 = vmatpush.msra.mxu3 %v1635_v4 }
  0x61   : > { %644 = vmatpush.msra.mxu0 %v1639_v5  ;;  %664 = vmatpush.msra.mxu1 %v1641_v6 }
  0x62   : > { %684 = vmatpush.msra.mxu2 %v1645_v7  ;;  %704 = vmatpush.msra.mxu3 %v1647_v8 }
  0x63   : > { %645 = vmatpush.msra.mxu0 %v1651_v9  ;;  %665 = vmatpush.msra.mxu1 %v1653_v26 }
  0x64   : > { %685 = vmatpush.msra.mxu2 %v1657_v43  ;;  %705 = vmatpush.msra.mxu3 %v1659_v60 }
  0x65   : > { %781 = vmatpush.msrb.mxu0 %v1456_v10  ;;  %801 = vmatpush.msrb.mxu1 %v1458_v11 }
  0x66   : > { %821 = vmatpush.msrb.mxu2 %v1462_v12  ;;  %841 = vmatpush.msrb.mxu3 %v1464_v13 }
  0x67   : > { %782 = vmatpush.msrb.mxu0 %v1468_v14  ;;  %802 = vmatpush.msrb.mxu1 %v1470_v15 }
  0x68   : > { %822 = vmatpush.msrb.mxu2 %v1474_v16  ;;  %842 = vmatpush.msrb.mxu3 %v1476_v17 }
  0x69   : > { %783 = vmatpush.msrb.mxu0 %v1480_v18  ;;  %803 = vmatpush.msrb.mxu1 %v1482_v19 }
  0x6a   : > { %823 = vmatpush.msrb.mxu2 %v1486_v20  ;;  %843 = vmatpush.msrb.mxu3 %v1488_v21 }
  0x6b   : > { %784 = vmatpush.msrb.mxu0 %v1492_v22  ;;  %804 = vmatpush.msrb.mxu1 %v1494_v23 }
  0x6c   : > { %824 = vmatpush.msrb.mxu2 %v1498_v24  ;;  %844 = vmatpush.msrb.mxu3 %v1500_v25 }
  0x6d   : > { %785 = vmatpush.msrb.mxu0 %v1509_v27  ;;  %805 = vmatpush.msrb.mxu1 %v1511_v28 }
  0x6e   : > { %825 = vmatpush.msrb.mxu2 %v1515_v29  ;;  %845 = vmatpush.msrb.mxu3 %v1517_v30 }
  0x6f   : > { %786 = vmatpush.msrb.mxu0 %v1521_v31  ;;  %806 = vmatpush.msrb.mxu1 %v1523_v32 }
  0x70   : > { %826 = vmatpush.msrb.mxu2 %v1527_v33  ;;  %846 = vmatpush.msrb.mxu3 %v1529_v34 }
  0x71   : > { %787 = vmatpush.msrb.mxu0 %v1533_v35  ;;  %807 = vmatpush.msrb.mxu1 %v1535_v36 }
  0x72   : > { %827 = vmatpush.msrb.mxu2 %v1539_v37  ;;  %847 = vmatpush.msrb.mxu3 %v1541_v38 }
  0x73   : > { %788 = vmatpush.msrb.mxu0 %v1545_v39  ;;  %808 = vmatpush.msrb.mxu1 %v1547_v40 }
  0x74   : > { %828 = vmatpush.msrb.mxu2 %v1551_v41  ;;  %848 = vmatpush.msrb.mxu3 %v1553_v42 }
  0x75   : > { %789 = vmatpush.msrb.mxu0 %v1562_v44  ;;  %809 = vmatpush.msrb.mxu1 %v1564_v45 }
  0x76   : > { %829 = vmatpush.msrb.mxu2 %v1568_v46  ;;  %849 = vmatpush.msrb.mxu3 %v1570_v47 }
  0x77   : > { %790 = vmatpush.msrb.mxu0 %v1574_v48  ;;  %810 = vmatpush.msrb.mxu1 %v1576_v49 }
  0x78   : > { %830 = vmatpush.msrb.mxu2 %v1580_v50  ;;  %850 = vmatpush.msrb.mxu3 %v1582_v51 }
  0x79   : > { %791 = vmatpush.msrb.mxu0 %v1586_v52  ;;  %811 = vmatpush.msrb.mxu1 %v1588_v53 }
  0x7a   : > { %831 = vmatpush.msrb.mxu2 %v1592_v54  ;;  %851 = vmatpush.msrb.mxu3 %v1594_v55 }
  0x7b   : > { %792 = vmatpush.msrb.mxu0 %v1598_v56  ;;  %812 = vmatpush.msrb.mxu1 %v1600_v57 }
  0x7c   : > { %832 = vmatpush.msrb.mxu2 %v1604_v58  ;;  %852 = vmatpush.msrb.mxu3 %v1606_v59 }
  0x7d   : > { %793 = vmatpush.msrb.mxu0 %v1615_v61  ;;  %813 = vmatpush.msrb.mxu1 %v1617_v62 }
  0x7e   : > { %833 = vmatpush.msrb.mxu2 %v1621_v63  ;;  %853 = vmatpush.msrb.mxu3 %v1623_v0 }
  0x7f   : > { %794 = vmatpush.msrb.mxu0 %v1627_v1  ;;  %814 = vmatpush.msrb.mxu1 %v2029_v2 }
  0x80   : > { %834 = vmatpush.msrb.mxu2 %v1633_v3  ;;  %854 = vmatpush.msrb.mxu3 %v1635_v4 }
  0x81   : > { %795 = vmatpush.msrb.mxu0 %v1639_v5  ;;  %815 = vmatpush.msrb.mxu1 %v1641_v6  ;;  %v274_v5 = vld [vmem:[%s1971_s3] sm:$0xf] }
  0x82   : > { %835 = vmatpush.msrb.mxu2 %v1645_v7  ;;  %855 = vmatpush.msrb.mxu3 %v1647_v8  ;;  %v276_v1 = vperm.slane %v274_v5, 0  ;;  %v277_v7 = vperm.slane %v274_v5, 1 }
  0x83   : > { %796 = vmatpush.msrb.mxu0 %v1651_v9  ;;  %816 = vmatpush.msrb.mxu1 %v1653_v26  ;;  %v278_v26 = vperm.slane %v274_v5, 2 }
  0x84   : > { %836 = vmatpush.msrb.mxu2 %v1657_v43  ;;  %856 = vmatpush.msrb.mxu3 %v1659_v60  ;;  %v279_v43 = vperm.slane %v274_v5, 3 }
  0x98   : > { %v314_v2 = vpop.f32.mrf.mxu0  ;;  %v343_v3 = vpop.f32.mrf.mxu1 }
  0x9f   : > { %v372_v4 = vpop.f32.mrf.mxu2  ;;  %v401_v6 = vpop.f32.mrf.mxu3 }
  0xa0   : > { %v402_v51 = vadd.f32 %v401_v6, %v279_v43 }
  0xa2   : > { %v317_v0 = vpop.f32.mrf.mxu0  ;;  %v346_v8 = vpop.f32.mrf.mxu1 }
  0xa3   : > { %v1798_v63 = vadd.f32 %v317_v0, %v276_v1  ;;  %v1800_v9 = vadd.f32 %v346_v8, %v277_v7 }
  0xa5   : > { %2030 = vst [vmem:[#allocation34_spill] sm:$0xff] %v1798_v63 }
  0xa6   : > { %2031 = vst [vmem:[#allocation35_spill] sm:$0xff] %v1800_v9 }
  0xa9   : > { %v375_v62 = vpop.f32.mrf.mxu2  ;;  %v404_v60 = vpop.f32.mrf.mxu3 }
  0xaa   : > { %v1802_v61 = vadd.f32 %v375_v62, %v278_v26  ;;  %v1804_v59 = vadd.f32 %v404_v60, %v279_v43 }
  0xac   : > { %2032 = vst [vmem:[#allocation36_spill] sm:$0xff] %v1802_v61  ;;  %v320_v58 = vpop.f32.mrf.mxu0  ;;  %v349_v57 = vpop.f32.mrf.mxu1 }
  0xad   : > { %2033 = vst [vmem:[#allocation37_spill] sm:$0xff] %v1804_v59  ;;  %v1806_v56 = vadd.f32 %v320_v58, %v276_v1  ;;  %v1808_v55 = vadd.f32 %v349_v57, %v277_v7  ;;  %v315_v57 = vadd.f32 %v314_v2, %v276_v1 }
  0xaf   : > { %2034 = vst [vmem:[#allocation38_spill] sm:$0xff] %v1806_v56 }
  0xb0   : > { %2035 = vst [vmem:[#allocation39_spill] sm:$0xff] %v1808_v55  ;;  %v344_v55 = vadd.f32 %v343_v3, %v277_v7 }
  0xb3   : > { %v378_v54 = vpop.f32.mrf.mxu2  ;;  %v407_v53 = vpop.f32.mrf.mxu3 }
  0xb4   : > { %v1810_v0 = vadd.f32 %v378_v54, %v278_v26  ;;  %v1812_v8 = vadd.f32 %v407_v53, %v279_v43 }
  0xb6   : > { %2036 = vst [vmem:[#allocation40_spill] sm:$0xff] %v1810_v0  ;;  %v323_v9 = vpop.f32.mrf.mxu0  ;;  %v352_v5 = vpop.f32.mrf.mxu1 }
  0xb7   : > { %2037 = vst [vmem:[#allocation41_spill] sm:$0xff] %v1812_v8  ;;  %v1814_v63 = vadd.f32 %v323_v9, %v276_v1  ;;  %v1816_v62 = vadd.f32 %v352_v5, %v277_v7  ;;  %v373_v7 = vadd.f32 %v372_v4, %v278_v26 }
  0xb9   : > { %2038 = vst [vmem:[#allocation42_spill] sm:$0xff] %v1814_v63 }
  0xba   : > { %2039 = vst [vmem:[#allocation43_spill] sm:$0xff] %v1816_v62 }
  0xbd   : > { %v381_v60 = vpop.f32.mrf.mxu2  ;;  %v410_v61 = vpop.f32.mrf.mxu3 }
  0xbe   : > { %v1818_v59 = vadd.f32 %v381_v60, %v278_v26  ;;  %v1820_v58 = vadd.f32 %v410_v61, %v279_v43 }
  0xc0   : > { %2040 = vst [vmem:[#allocation44_spill] sm:$0xff] %v1818_v59  ;;  %v497_v56 = vpop.f32.mrf.mxu0  ;;  %v517_v52 = vpop.f32.mrf.mxu1 }
  0xc1   : > { %2041 = vst [vmem:[#allocation45_spill] sm:$0xff] %v1820_v58  ;;  %v560_v54 = vadd.f32 %v497_v56, %v315_v57  ;;  %v561_v0 = vadd.f32 %v517_v52, %v344_v55 }
  0xc3   : > { %v1211_v53 = vmul.f32 -1.442695, %v560_v54  ;;  %v1212_v8 = vmul.f32 -1.442695, %v561_v0 }
  0xc5   : > { %1262 = vpow2.f32 %v1211_v53 }
  0xc6   : > { %1264 = vpow2.f32 %v1212_v8 }
  0xc7   : > { %v557_v9 = vpop.f32.mrf.mxu3  ;;  %v537_v1 = vpop.f32.mrf.mxu2 }
  0xc8   : > { %v563_v5 = vadd.f32 %v557_v9, %v402_v51  ;;  %v562_v55 = vadd.f32 %v537_v1, %v373_v7 }
  0xca   : > { %v1213_v62 = vmul.f32 -1.442695, %v563_v5 }
  0xcb   : > { %v1263_v63 = vpop.eup %1262 }
  0xcc   : > { %v1265_v50 = vpop.eup %1264  ;;  %v567_v60 = vadd.f32 1.0, %v1263_v63  ;;  %1266 = vpow2.f32 %v1213_v62 }
  0xcd   : > { %v586_v61 = vadd.f32 1.0, %v1265_v50 }
  0xce   : > { %1268 = vrcp.f32 %v567_v60  ;;  %v579_v8 = vand.u32 2147483648, %v567_v60  ;;  %v577_v50 = vand.u32 2147483647, %v567_v60  ;;  %vm573_vm3 = vweird.f32 %v567_v60 }
  0xcf   : > { %1270 = vrcp.f32 %v586_v61  ;;  %v598_v57 = vand.u32 2147483648, %v586_v61  ;;  %v596_v54 = vand.u32 2147483647, %v586_v61  ;;  %vm592_vm4 = vweird.f32 %v586_v61 }
  0xd0   : > { %v580_v26 = vor.u32 1.1754944e-38, %v579_v8  ;;  %vm578_vm7 = vcmp.eq.f32.partialorder %v577_v50, 8.507059e+37 }
  0xd1   : > { %v599_v1 = vor.u32 1.1754944e-38, %v598_v57  ;;  %vm597_vm8 = vcmp.eq.f32.partialorder %v596_v54, 8.507059e+37 }
  0xd2   : > { %v1267_v3 = vpop.eup %1266 }
  0xd3   : > { %v606_v56 = vadd.f32 1.0, %v1267_v3  ;;  %v478_v3 = vld [vmem:[#allocation4] sm:$0xff] }
  0xd4   : > { %v1269_v52 = vpop.eup %1268 }
  0xd5   : > { %v1271_v2 = vpop.eup %1270  ;;  %v569_v0 = vmul.f32 %v1269_v52, %v567_v60  ;;  %1272 = vrcp.f32 %v606_v56  ;;  %vm574_vm1 = vweird.f32 %v1269_v52  ;;  %v618_v8 = vand.u32 2147483648, %v606_v56 }
  0xd6   : > { %v588_v6 = vmul.f32 %v1271_v2, %v586_v61  ;;  %1274 = vtanh.f32 %v562_v55  ;;  %vm593_vm2 = vweird.f32 %v1271_v2  ;;  %vm575_vm5 = vmor %vm573_vm3, %vm574_vm1  ;;  %vm612_vm10 = vweird.f32 %v606_v56 }
  0xd7   : > { %v570_v43 = vsub.f32 1.0, %v569_v0  ;;  %vm594_vm6 = vmor %vm592_vm4, %vm593_vm2  ;;  %v616_v57 = vand.u32 2147483647, %v606_v56  ;;  %v619_v50 = vor.u32 1.1754944e-38, %v618_v8 }
  0xd8   : > { %v589_v51 = vsub.f32 1.0, %v588_v6 }
  0xd9   : > { %v571_v63 = vmul.f32 %v1269_v52, %v570_v43  ;;  %vm617_vm12 = vcmp.eq.f32.partialorder %v616_v57, 8.507059e+37 }
  0xda   : > { %v590_v62 = vmul.f32 %v1271_v2, %v589_v51 }
  0xdb   : > { %v1273_v53 = vpop.eup %1272  ;;  %v572_v4 = vadd.f32 %v1269_v52, %v571_v63 }
  0xdc   : > { %v591_v9 = vadd.f32 %v1271_v2, %v590_v62  ;;  %v608_v5 = vmul.f32 %v1273_v53, %v606_v56  ;;  %v1275_v55 = vpop.eup %1274  ;;  %vm613_vm9 = vweird.f32 %v1273_v53 }
  0xdd   : > { %v576_v7 = vsel %vm575_vm5, %v1269_v52, %v572_v4  ;;  %vm614_vm11 = vmor %vm612_vm10, %vm613_vm9 }
  0xde   : > { %v581_v0 = vsel %vm578_vm7, %v580_v26, %v576_v7  ;;  %v595_v6 = vsel %vm594_vm6, %v1271_v2, %v591_v9  ;;  %v609_v43 = vsub.f32 1.0, %v608_v5 }
  0xdf   : > { %v600_v51 = vsel %vm597_vm8, %v599_v1, %v595_v6  ;;  %v623_v59 = vmul.f32 %v1275_v55, %v581_v0  ;;  %v2071_v1 = vld [vmem:[#allocation36_spill] sm:$0xff] }
  0xe0   : > { %v622_v58 = vmul.f32 %v600_v51, %v478_v3  ;;  %v610_v63 = vmul.f32 %v1273_v53, %v609_v43 }
  0xe2   : > { %v1822_v60 = vadd.f32 %v623_v59, %v622_v58  ;;  %v611_v61 = vadd.f32 %v1273_v53, %v610_v63 }
  0xe4   : > { %1276 = vtanh.f32 %v1822_v60  ;;  %v615_v52 = vsel %vm614_vm11, %v1273_v53, %v611_v61 }
  0xe5   : > { %v620_v62 = vsel %vm617_vm12, %v619_v50, %v615_v52 }
  0xea   : > { %v1277_v2 = vpop.eup %1276 }
  0xeb   : > { %v626_v54 = vmul.f32 %v1277_v2, %v620_v62 }
  0xed   : > { %646 = vmatmul.f32.vlgmr.msra.gmra.mxu0 %v626_v54  ;;  %666 = vmatmul.f32.vlgmr.msra.gmra.mxu1 %v626_v54 }
  0xee   : > { %686 = vmatmul.f32.vlgmr.msra.gmra.mxu2 %v626_v54  ;;  %706 = vmatmul.f32.vlgmr.msra.gmra.mxu3 %v626_v54 }
  0xef   : > { %932 = vmatpush.msra.mxu0 %v1456_v10  ;;  %952 = vmatpush.msra.mxu1 %v1458_v11  ;;  %v2042_v10 = vld [vmem:[#allocation8_spill] sm:$0xff]  ;;  %v2043_v11 = vld [vmem:[#allocation9_spill] sm:$0xff] }
  0xf0   : > { %972 = vmatpush.msra.mxu2 %v1462_v12  ;;  %992 = vmatpush.msra.mxu3 %v1464_v13  ;;  %v2044_v12 = vld [vmem:[#allocation10_spill] sm:$0xff]  ;;  %v2045_v13 = vld [vmem:[#allocation11_spill] sm:$0xff] }
  0xf1   : > { %933 = vmatpush.msra.mxu0 %v1468_v14  ;;  %953 = vmatpush.msra.mxu1 %v1470_v15  ;;  %v2046_v14 = vld [vmem:[#allocation12_spill] sm:$0xff]  ;;  %v2047_v15 = vld [vmem:[#allocation13_spill] sm:$0xff] }
  0xf2   : > { %973 = vmatpush.msra.mxu2 %v1474_v16  ;;  %993 = vmatpush.msra.mxu3 %v1476_v17  ;;  %v2048_v16 = vld [vmem:[#allocation14_spill] sm:$0xff]  ;;  %v2049_v17 = vld [vmem:[#allocation15_spill] sm:$0xff] }
  0xf3   : > { %934 = vmatpush.msra.mxu0 %v1480_v18  ;;  %954 = vmatpush.msra.mxu1 %v1482_v19  ;;  %v2050_v18 = vld [vmem:[#allocation16_spill] sm:$0xff]  ;;  %v2051_v19 = vld [vmem:[#allocation17_spill] sm:$0xff] }
  0xf4   : > { %974 = vmatpush.msra.mxu2 %v1486_v20  ;;  %994 = vmatpush.msra.mxu3 %v1488_v21  ;;  %v2052_v20 = vld [vmem:[#allocation18_spill] sm:$0xff]  ;;  %v2053_v21 = vld [vmem:[#allocation19_spill] sm:$0xff] }
  0xf5   : > { %935 = vmatpush.msra.mxu0 %v1492_v22  ;;  %955 = vmatpush.msra.mxu1 %v1494_v23  ;;  %v2054_v22 = vld [vmem:[#allocation20_spill] sm:$0xff]  ;;  %v2055_v23 = vld [vmem:[#allocation21_spill] sm:$0xff] }
  0xf6   : > { %975 = vmatpush.msra.mxu2 %v1498_v24  ;;  %995 = vmatpush.msra.mxu3 %v1500_v25  ;;  %v2056_v24 = vld [vmem:[#allocation22_spill] sm:$0xff]  ;;  %v2057_v25 = vld [vmem:[#allocation23_spill] sm:$0xff] }
  0xf7   : > { %936 = vmatpush.msra.mxu0 %v1509_v27  ;;  %956 = vmatpush.msra.mxu1 %v1511_v28  ;;  %v2058_v27 = vld [vmem:[#allocation24_spill] sm:$0xff]  ;;  %v2059_v28 = vld [vmem:[#allocation25_spill] sm:$0xff] }
  0xf8   : > { %976 = vmatpush.msra.mxu2 %v1515_v29  ;;  %996 = vmatpush.msra.mxu3 %v1517_v30  ;;  %v2060_v29 = vld [vmem:[#allocation26_spill] sm:$0xff]  ;;  %v2061_v30 = vld [vmem:[#allocation27_spill] sm:$0xff] }
  0xf9   : > { %937 = vmatpush.msra.mxu0 %v1521_v31  ;;  %957 = vmatpush.msra.mxu1 %v1523_v32  ;;  %v2062_v31 = vld [vmem:[#allocation28_spill] sm:$0xff]  ;;  %v2063_v32 = vld [vmem:[#allocation29_spill] sm:$0xff] }
  0xfa   : > { %977 = vmatpush.msra.mxu2 %v1527_v33  ;;  %997 = vmatpush.msra.mxu3 %v1529_v34  ;;  %v2064_v33 = vld [vmem:[#allocation30_spill] sm:$0xff]  ;;  %v2065_v34 = vld [vmem:[#allocation31_spill] sm:$0xff] }
  0xfb   : > { %938 = vmatpush.msra.mxu0 %v1533_v35  ;;  %958 = vmatpush.msra.mxu1 %v1535_v36  ;;  %v2066_v35 = vld [vmem:[#allocation32_spill] sm:$0xff]  ;;  %v2067_v36 = vld [vmem:[#allocation33_spill] sm:$0xff] }
  0xfc   : > { %978 = vmatpush.msra.mxu2 %v1539_v37  ;;  %998 = vmatpush.msra.mxu3 %v1541_v38 }
  0xfd   : > { %939 = vmatpush.msra.mxu0 %v1545_v39  ;;  %959 = vmatpush.msra.mxu1 %v1547_v40  ;;  %v2068_v39 = vld [vmem:[#allocation34_spill] sm:$0xff] }
  0xfe   : > { %979 = vmatpush.msra.mxu2 %v1551_v41  ;;  %999 = vmatpush.msra.mxu3 %v1553_v42  ;;  %v2069_v41 = vld [vmem:[#allocation35_spill] sm:$0xff] }
  0xff   : > { %940 = vmatpush.msra.mxu0 %v1562_v44  ;;  %960 = vmatpush.msra.mxu1 %v1564_v45 }
 0x100   : > { %980 = vmatpush.msra.mxu2 %v1568_v46  ;;  %1000 = vmatpush.msra.mxu3 %v1570_v47  ;;  %v2070_v47 = vld [vmem:[#allocation37_spill] sm:$0xff] }
 0x101   : > { %941 = vmatpush.msra.mxu0 %v1574_v48  ;;  %961 = vmatpush.msra.mxu1 %v1576_v49 }
 0x102   : > { %981 = vmatpush.msra.mxu2 %v2042_v10  ;;  %1001 = vmatpush.msra.mxu3 %v2043_v11 }
 0x103   : > { %942 = vmatpush.msra.mxu0 %v2044_v12  ;;  %962 = vmatpush.msra.mxu1 %v2045_v13 }
 0x104   : > { %982 = vmatpush.msra.mxu2 %v2046_v14  ;;  %1002 = vmatpush.msra.mxu3 %v2047_v15 }
 0x105   : > { %943 = vmatpush.msra.mxu0 %v2048_v16  ;;  %963 = vmatpush.msra.mxu1 %v2049_v17 }
 0x106   : > { %983 = vmatpush.msra.mxu2 %v2050_v18  ;;  %1003 = vmatpush.msra.mxu3 %v2051_v19 }
 0x107   : > { %944 = vmatpush.msra.mxu0 %v2052_v20  ;;  %964 = vmatpush.msra.mxu1 %v2053_v21 }
 0x108   : > { %984 = vmatpush.msra.mxu2 %v2054_v22  ;;  %1004 = vmatpush.msra.mxu3 %v2055_v23 }
 0x109   : > { %945 = vmatpush.msra.mxu0 %v2056_v24  ;;  %965 = vmatpush.msra.mxu1 %v2057_v25 }
 0x10a   : > { %985 = vmatpush.msra.mxu2 %v2058_v27  ;;  %1005 = vmatpush.msra.mxu3 %v2059_v28 }
 0x10b   : > { %946 = vmatpush.msra.mxu0 %v2060_v29  ;;  %966 = vmatpush.msra.mxu1 %v2061_v30 }
 0x10c   : > { %986 = vmatpush.msra.mxu2 %v2062_v31  ;;  %1006 = vmatpush.msra.mxu3 %v2063_v32  ;;  %v2072_v32 = vld [vmem:[#allocation38_spill] sm:$0xff] }
 0x10d   : > { %947 = vmatpush.msra.mxu0 %v2064_v33  ;;  %967 = vmatpush.msra.mxu1 %v2065_v34  ;;  %v2073_v34 = vld [vmem:[#allocation39_spill] sm:$0xff] }
 0x10e   : > { %987 = vmatpush.msra.mxu2 %v2066_v35  ;;  %1007 = vmatpush.msra.mxu3 %v2067_v36 }
 0x16a   : > { %v647_v37 = vpop.f32.mrf.mxu0  ;;  %v667_v38 = vpop.f32.mrf.mxu1 }
 0x16b   : > { %v710_v40 = vadd.f32 %v647_v37, %v2068_v39  ;;  %v711_v42 = vadd.f32 %v667_v38, %v2069_v41  ;;  %v2074_v39 = vld [vmem:[#allocation41_spill] sm:$0xff] }
 0x16d   : > { %v1215_v44 = vmul.f32 -1.442695, %v710_v40  ;;  %v1216_v45 = vmul.f32 -1.442695, %v711_v42 }
 0x16f   : > { %1278 = vpow2.f32 %v1215_v44 }
 0x170   : > { %1280 = vpow2.f32 %v1216_v45 }
 0x171   : > { %v707_v46 = vpop.f32.mrf.mxu3  ;;  %v687_v4 = vpop.f32.mrf.mxu2 }
 0x172   : > { %v713_v48 = vadd.f32 %v707_v46, %v2070_v47  ;;  %v712_v3 = vadd.f32 %v687_v4, %v2071_v1 }
 0x174   : > { %v1217_v49 = vmul.f32 -1.442695, %v713_v48 }
 0x175   : > { %v1279_v59 = vpop.eup %1278 }
 0x176   : > { %v1281_v58 = vpop.eup %1280  ;;  %v717_v56 = vadd.f32 1.0, %v1279_v59  ;;  %1282 = vpow2.f32 %v1217_v49 }
 0x177   : > { %v736_v53 = vadd.f32 1.0, %v1281_v58  ;;  %v2075_v58 = vld [vmem:[#allocation40_spill] sm:$0xff] }
 0x178   : > { %1284 = vrcp.f32 %v717_v56  ;;  %v729_v51 = vand.u32 2147483648, %v717_v56  ;;  %v727_v8 = vand.u32 2147483647, %v717_v56  ;;  %vm723_vm15 = vweird.f32 %v717_v56 }
 0x179   : > { %1286 = vrcp.f32 %v736_v53  ;;  %v748_v63 = vand.u32 2147483648, %v736_v53  ;;  %v746_v52 = vand.u32 2147483647, %v736_v53  ;;  %vm742_vm0 = vweird.f32 %v736_v53 }
 0x17a   : > { %v730_v62 = vor.u32 1.1754944e-38, %v729_v51  ;;  %vm728_vm3 = vcmp.eq.f32.partialorder %v727_v8, 8.507059e+37 }
 0x17b   : > { %v749_v11 = vor.u32 1.1754944e-38, %v748_v63  ;;  %vm747_vm4 = vcmp.eq.f32.partialorder %v746_v52, 8.507059e+37 }
 0x17c   : > { %v1283_v26 = vpop.eup %1282 }
 0x17d   : > { %v756_v9 = vadd.f32 1.0, %v1283_v26 }
 0x17e   : > { %v1285_v5 = vpop.eup %1284 }
 0x17f   : > { %v1287_v7 = vpop.eup %1286  ;;  %v719_v55 = vmul.f32 %v1285_v5, %v717_v56  ;;  %1288 = vrcp.f32 %v756_v9  ;;  %vm724_vm13 = vweird.f32 %v1285_v5  ;;  %v768_v23 = vand.u32 2147483648, %v756_v9 }
 0x180   : > { %v738_v0 = vmul.f32 %v1287_v7, %v736_v53  ;;  %1290 = vtanh.f32 %v712_v3  ;;  %vm743_vm14 = vweird.f32 %v1287_v7  ;;  %vm725_vm1 = vmor %vm723_vm15, %vm724_vm13  ;;  %vm762_vm6 = vweird.f32 %v756_v9 }
 0x181   : > { %v720_v6 = vsub.f32 1.0, %v719_v55  ;;  %vm744_vm2 = vmor %vm742_vm0, %vm743_vm14  ;;  %v766_v24 = vand.u32 2147483647, %v756_v9  ;;  %v769_v27 = vor.u32 1.1754944e-38, %v768_v23 }
 0x182   : > { %v739_v43 = vsub.f32 1.0, %v738_v0 }
 0x183   : > { %v721_v61 = vmul.f32 %v1285_v5, %v720_v6  ;;  %vm767_vm8 = vcmp.eq.f32.partialorder %v766_v24, 8.507059e+37 }
 0x184   : > { %v740_v57 = vmul.f32 %v1287_v7, %v739_v43 }
 0x185   : > { %v1289_v50 = vpop.eup %1288  ;;  %v722_v2 = vadd.f32 %v1285_v5, %v721_v61 }
 0x186   : > { %v741_v54 = vadd.f32 %v1287_v7, %v740_v57  ;;  %v758_v10 = vmul.f32 %v1289_v50, %v756_v9  ;;  %v1291_v13 = vpop.eup %1290  ;;  %vm763_vm5 = vweird.f32 %v1289_v50 }
 0x187   : > { %v726_v12 = vsel %vm725_vm1, %v1285_v5, %v722_v2  ;;  %vm764_vm7 = vmor %vm762_vm6, %vm763_vm5 }
 0x188   : > { %v731_v14 = vsel %vm728_vm3, %v730_v62, %v726_v12  ;;  %v745_v15 = vsel %vm744_vm2, %v1287_v7, %v741_v54  ;;  %v759_v16 = vsub.f32 1.0, %v758_v10 }
 0x189   : > { %v750_v17 = vsel %vm747_vm4, %v749_v11, %v745_v15  ;;  %v773_v18 = vmul.f32 %v1291_v13, %v731_v14 }
 0x18a   : > { %v772_v19 = vmul.f32 %v750_v17, %v1822_v60  ;;  %v760_v20 = vmul.f32 %v1289_v50, %v759_v16 }
 0x18c   : > { %v1894_v21 = vadd.f32 %v773_v18, %v772_v19  ;;  %v761_v22 = vadd.f32 %v1289_v50, %v760_v20 }
 0x18e   : > { %1292 = vtanh.f32 %v1894_v21  ;;  %v765_v25 = vsel %vm764_vm7, %v1289_v50, %v761_v22 }
 0x18f   : > { %v770_v29 = vsel %vm767_vm8, %v769_v27, %v765_v25  ;;  %v2076_v25 = vld [vmem:[#allocation42_spill] sm:$0xff] }
 0x194   : > { %v1293_v28 = vpop.eup %1292 }
 0x195   : > { %v776_v30 = vmul.f32 %v1293_v28, %v770_v29  ;;  %v2077_v28 = vld [vmem:[#allocation43_spill] sm:$0xff] }
 0x197   : > { %797 = vmatmul.f32.vlgmr.msrb.gmra.mxu0 %v776_v30  ;;  %817 = vmatmul.f32.vlgmr.msrb.gmra.mxu1 %v776_v30 }
 0x198   : > { %837 = vmatmul.f32.vlgmr.msrb.gmra.mxu2 %v776_v30  ;;  %857 = vmatmul.f32.vlgmr.msrb.gmra.mxu3 %v776_v30 }
 0x214   : > { %v798_v60 = vpop.f32.mrf.mxu0  ;;  %v818_v31 = vpop.f32.mrf.mxu1 }
 0x215   : > { %v861_v33 = vadd.f32 %v798_v60, %v2072_v32  ;;  %v862_v35 = vadd.f32 %v818_v31, %v2073_v34  ;;  %v2078_v32 = vld [vmem:[#allocation45_spill] sm:$0xff] }
 0x217   : > { %v1221_v36 = vmul.f32 -1.442695, %v861_v33  ;;  %v1222_v37 = vmul.f32 -1.442695, %v862_v35 }
 0x219   : > { %1294 = vpow2.f32 %v1221_v36 }
 0x21a   : > { %1296 = vpow2.f32 %v1222_v37 }
 0x21b   : > { %v858_v38 = vpop.f32.mrf.mxu3  ;;  %v838_v47 = vpop.f32.mrf.mxu2 }
 0x21c   : > { %v864_v40 = vadd.f32 %v858_v38, %v2074_v39  ;;  %v863_v56 = vadd.f32 %v838_v47, %v2075_v58 }
 0x21e   : > { %v1223_v41 = vmul.f32 -1.442695, %v864_v40 }
 0x21f   : > { %v1295_v42 = vpop.eup %1294 }
 0x220   : > { %v1297_v44 = vpop.eup %1296  ;;  %v868_v45 = vadd.f32 1.0, %v1295_v42  ;;  %1298 = vpow2.f32 %v1223_v41 }
 0x221   : > { %v887_v46 = vadd.f32 1.0, %v1297_v44  ;;  %v2079_v44 = vld [vmem:[#allocation44_spill] sm:$0xff] }
 0x222   : > { %1300 = vrcp.f32 %v868_v45  ;;  %v880_v1 = vand.u32 2147483648, %v868_v45  ;;  %v878_v55 = vand.u32 2147483647, %v868_v45  ;;  %vm874_vm11 = vweird.f32 %v868_v45 }
 0x223   : > { %1302 = vrcp.f32 %v887_v46  ;;  %v899_v3 = vand.u32 2147483648, %v887_v46  ;;  %v897_v6 = vand.u32 2147483647, %v887_v46  ;;  %vm893_vm12 = vweird.f32 %v887_v46 }
 0x224   : > { %v881_v63 = vor.u32 1.1754944e-38, %v880_v1  ;;  %vm879_vm15 = vcmp.eq.f32.partialorder %v878_v55, 8.507059e+37 }
 0x225   : > { %v900_v57 = vor.u32 1.1754944e-38, %v899_v3  ;;  %vm898_vm0 = vcmp.eq.f32.partialorder %v897_v6, 8.507059e+37 }
 0x226   : > { %v1299_v48 = vpop.eup %1298 }
 0x227   : > { %v907_v49 = vadd.f32 1.0, %v1299_v48 }
 0x228   : > { %v1301_v59 = vpop.eup %1300 }
 0x229   : > { %v1303_v53 = vpop.eup %1302  ;;  %v870_v4 = vmul.f32 %v1301_v59, %v868_v45  ;;  %1304 = vrcp.f32 %v907_v49  ;;  %vm875_vm9 = vweird.f32 %v1301_v59  ;;  %v919_v16 = vand.u32 2147483648, %v907_v49 }
 0x22a   : > { %v889_v26 = vmul.f32 %v1303_v53, %v887_v46  ;;  %1306 = vtanh.f32 %v863_v56  ;;  %vm894_vm10 = vweird.f32 %v1303_v53  ;;  %vm876_vm13 = vmor %vm874_vm11, %vm875_vm9  ;;  %vm913_vm2 = vweird.f32 %v907_v49 }
 0x22b   : > { %v871_v9 = vsub.f32 1.0, %v870_v4  ;;  %vm895_vm14 = vmor %vm893_vm12, %vm894_vm10  ;;  %v917_v17 = vand.u32 2147483647, %v907_v49  ;;  %v920_v19 = vor.u32 1.1754944e-38, %v919_v16 }
 0x22c   : > { %v890_v5 = vsub.f32 1.0, %v889_v26 }
 0x22d   : > { %v872_v7 = vmul.f32 %v1301_v59, %v871_v9  ;;  %vm918_vm4 = vcmp.eq.f32.partialorder %v917_v17, 8.507059e+37 }
 0x22e   : > { %v891_v0 = vmul.f32 %v1303_v53, %v890_v5 }
 0x22f   : > { %v1305_v43 = vpop.eup %1304  ;;  %v873_v51 = vadd.f32 %v1301_v59, %v872_v7 }
 0x230   : > { %v892_v61 = vadd.f32 %v1303_v53, %v891_v0  ;;  %v909_v8 = vmul.f32 %v1305_v43, %v907_v49  ;;  %v1307_v50 = vpop.eup %1306  ;;  %vm914_vm1 = vweird.f32 %v1305_v43 }
 0x231   : > { %v877_v52 = vsel %vm876_vm13, %v1301_v59, %v873_v51  ;;  %vm915_vm3 = vmor %vm913_vm2, %vm914_vm1 }
 0x232   : > { %v882_v2 = vsel %vm879_vm15, %v881_v63, %v877_v52  ;;  %v896_v62 = vsel %vm895_vm14, %v1303_v53, %v892_v61  ;;  %v910_v54 = vsub.f32 1.0, %v909_v8 }
 0x233   : > { %v901_v10 = vsel %vm898_vm0, %v900_v57, %v896_v62  ;;  %v924_v11 = vmul.f32 %v1307_v50, %v882_v2 }
 0x234   : > { %v923_v12 = vmul.f32 %v901_v10, %v1894_v21  ;;  %v911_v13 = vmul.f32 %v1305_v43, %v910_v54 }
 0x236   : > { %v1902_v14 = vadd.f32 %v924_v11, %v923_v12  ;;  %v912_v15 = vadd.f32 %v1305_v43, %v911_v13 }
 0x238   : > { %1308 = vtanh.f32 %v1902_v14  ;;  %v916_v18 = vsel %vm915_vm3, %v1305_v43, %v912_v15 }
 0x239   : > { %v921_v22 = vsel %vm918_vm4, %v920_v19, %v916_v18 }
 0x23e   : > { %v1309_v20 = vpop.eup %1308 }
 0x23f   : > { %v927_v23 = vmul.f32 %v1309_v20, %v921_v22 }
 0x241   : > { %948 = vmatmul.f32.vlgmr.msra.gmra.mxu0 %v927_v23  ;;  %968 = vmatmul.f32.vlgmr.msra.gmra.mxu1 %v927_v23 }
 0x242   : > { %988 = vmatmul.f32.vlgmr.msra.gmra.mxu2 %v927_v23  ;;  %1008 = vmatmul.f32.vlgmr.msra.gmra.mxu3 %v927_v23 }
 0x2be   : > { %v949_v21 = vpop.f32.mrf.mxu0  ;;  %v969_v24 = vpop.f32.mrf.mxu1 }
 0x2bf   : > { %v1012_v27 = vadd.f32 %v949_v21, %v2076_v25  ;;  %v1013_v29 = vadd.f32 %v969_v24, %v2077_v28 }
 0x2c1   : > { %v1227_v30 = vmul.f32 -1.442695, %v1012_v27  ;;  %v1228_v60 = vmul.f32 -1.442695, %v1013_v29 }
 0x2c3   : > { %1310 = vpow2.f32 %v1227_v30 }
 0x2c4   : > { %1312 = vpow2.f32 %v1228_v60 }
 0x2c5   : > { %v1009_v31 = vpop.f32.mrf.mxu3  ;;  %v989_v39 = vpop.f32.mrf.mxu2 }
 0x2c6   : > { %v1015_v33 = vadd.f32 %v1009_v31, %v2078_v32  ;;  %v1014_v45 = vadd.f32 %v989_v39, %v2079_v44 }
 0x2c8   : > { %v1229_v34 = vmul.f32 -1.442695, %v1015_v33 }
 0x2c9   : > { %v1311_v35 = vpop.eup %1310 }
 0x2ca   : > { %v1313_v36 = vpop.eup %1312  ;;  %v1019_v37 = vadd.f32 1.0, %v1311_v35  ;;  %1314 = vpow2.f32 %v1229_v34 }
 0x2cb   : > { %v1038_v38 = vadd.f32 1.0, %v1313_v36 }
 0x2cc   : > { %1316 = vrcp.f32 %v1019_v37  ;;  %v1031_v58 = vand.u32 2147483648, %v1019_v37  ;;  %v1029_v4 = vand.u32 2147483647, %v1019_v37  ;;  %vm1025_vm7 = vweird.f32 %v1019_v37 }
 0x2cd   : > { %1318 = vrcp.f32 %v1038_v38  ;;  %v1050_v56 = vand.u32 2147483648, %v1038_v38  ;;  %v1048_v9 = vand.u32 2147483647, %v1038_v38  ;;  %vm1044_vm8 = vweird.f32 %v1038_v38 }
 0x2ce   : > { %v1032_v3 = vor.u32 1.1754944e-38, %v1031_v58  ;;  %vm1030_vm11 = vcmp.eq.f32.partialorder %v1029_v4, 8.507059e+37 }
 0x2cf   : > { %v1051_v0 = vor.u32 1.1754944e-38, %v1050_v56  ;;  %vm1049_vm12 = vcmp.eq.f32.partialorder %v1048_v9, 8.507059e+37 }
 0x2d0   : > { %v1315_v40 = vpop.eup %1314 }
 0x2d1   : > { %v1058_v41 = vadd.f32 1.0, %v1315_v40 }
 0x2d2   : > { %v1317_v42 = vpop.eup %1316 }
 0x2d3   : > { %v1319_v46 = vpop.eup %1318  ;;  %v1021_v47 = vmul.f32 %v1317_v42, %v1019_v37  ;;  %1320 = vrcp.f32 %v1058_v41  ;;  %vm1026_vm5 = vweird.f32 %v1317_v42  ;;  %v1070_v54 = vand.u32 2147483648, %v1058_v41 }
 0x2d4   : > { %v1040_v48 = vmul.f32 %v1319_v46, %v1038_v38  ;;  %1322 = vtanh.f32 %v1014_v45  ;;  %vm1045_vm6 = vweird.f32 %v1319_v46  ;;  %vm1027_vm9 = vmor %vm1025_vm7, %vm1026_vm5  ;;  %vm1064_vm14 = vweird.f32 %v1058_v41 }
 0x2d5   : > { %v1022_v49 = vsub.f32 1.0, %v1021_v47  ;;  %vm1046_vm10 = vmor %vm1044_vm8, %vm1045_vm6  ;;  %v1068_v10 = vand.u32 2147483647, %v1058_v41  ;;  %v1071_v12 = vor.u32 1.1754944e-38, %v1070_v54 }
 0x2d6   : > { %v1041_v59 = vsub.f32 1.0, %v1040_v48 }
 0x2d7   : > { %v1023_v53 = vmul.f32 %v1317_v42, %v1022_v49  ;;  %vm1069_vm0 = vcmp.eq.f32.partialorder %v1068_v10, 8.507059e+37 }
 0x2d8   : > { %v1042_v26 = vmul.f32 %v1319_v46, %v1041_v59 }
 0x2d9   : > { %v1321_v5 = vpop.eup %1320  ;;  %v1024_v1 = vadd.f32 %v1317_v42, %v1023_v53 }
 0x2da   : > { %v1043_v7 = vadd.f32 %v1319_v46, %v1042_v26  ;;  %v1060_v55 = vmul.f32 %v1321_v5, %v1058_v41  ;;  %v1323_v43 = vpop.eup %1322  ;;  %vm1065_vm13 = vweird.f32 %v1321_v5 }
 0x2db   : > { %v1028_v6 = vsel %vm1027_vm9, %v1317_v42, %v1024_v1  ;;  %vm1066_vm15 = vmor %vm1064_vm14, %vm1065_vm13 }
 0x2dc   : > { %v1033_v51 = vsel %vm1030_vm11, %v1032_v3, %v1028_v6  ;;  %v1047_v63 = vsel %vm1046_vm10, %v1319_v46, %v1043_v7  ;;  %v1061_v61 = vsub.f32 1.0, %v1060_v55 }
 0x2dd   : > { %v1052_v8 = vsel %vm1049_vm12, %v1051_v0, %v1047_v63  ;;  %v1075_v57 = vmul.f32 %v1323_v43, %v1033_v51 }
 0x2de   : > { %v1074_v52 = vmul.f32 %v1052_v8, %v1902_v14  ;;  %v1062_v50 = vmul.f32 %v1321_v5, %v1061_v61 }
 0x2e0   : > { %v1076_v2 = vadd.f32 %v1075_v57, %v1074_v52  ;;  %v1063_v62 = vadd.f32 %v1321_v5, %v1062_v50 }
 0x2e2   : > { %1324 = vtanh.f32 %v1076_v2  ;;  %1084 = vst [vmem:[#allocation4] sm:$0xff] %v1076_v2  ;;  %v1067_v11 = vsel %vm1066_vm15, %v1321_v5, %v1063_v62 }
 0x2e3   : > { %v1072_v15 = vsel %vm1069_vm0, %v1071_v12, %v1067_v11 }
 0x2e7   : > { %1088 = sbr.rel (%p1233_p8) target bundleno = 909 (0x38d), region = 56 }
 0x2e8   : > { %v1325_v13 = vpop.eup %1324 }
 0x2e9   : > { %v1078_v16 = vmul.f32 %v1325_v13, %v1072_v15 }
 0x2eb   : > { %1083 = vst [vmem:[#allocation3] sm:$0xff] %v1078_v16 }
 0x2ec   : > { %v1104_v14 = vld [vmem:[%s1972_s4 + $0x78] sm:$0xff]  ;;  %v1103_v17 = vld [vmem:[%s1972_s4 + $0x70] sm:$0xff]  ;;  %v1102_v18 = vld [vmem:[%s1972_s4 + $0x68] sm:$0xff]  ;;  %vm1129_vm1 = vcmask 31744  }
 0x2ed   : > { %1109 = vmatpush.msra.mxu0 %v1104_v14  ;;  %v1101_v19 = vld [vmem:[%s1972_s4 + $0x60] sm:$0xff]  ;;  %v1100_v20 = vld [vmem:[%s1972_s4 + $0x58] sm:$0xff]  ;;  %v1099_v22 = vld [vmem:[%s1972_s4 + $0x50] sm:$0xff] }
 0x2ee   : > { %v1098_v23 = vld [vmem:[%s1972_s4 + $0x48] sm:$0xff]  ;;  %v1097_v21 = vld [vmem:[%s1972_s4 + $0x40] sm:$0xff]  ;;  %v1096_v24 = vld [vmem:[%s1972_s4 + $0x38] sm:$0xff] }
 0x2ef   : > { %1110 = vmatpush.msra.mxu0 %v1103_v17  ;;  %v1095_v25 = vld [vmem:[%s1972_s4 + $0x30] sm:$0xff]  ;;  %v1094_v27 = vld [vmem:[%s1972_s4 + $0x28] sm:$0xff]  ;;  %v1093_v28 = vld [vmem:[%s1972_s4 + $0x20] sm:$0xff] }
 0x2f0   : > { %v1092_v29 = vld [vmem:[%s1972_s4 + $0x18] sm:$0xff]  ;;  %v1091_v30 = vld [vmem:[%s1972_s4 + $0x10] sm:$0xff]  ;;  %v1090_v60 = vld [vmem:[%s1972_s4 + $0x8] sm:$0xff] }
 0x2f1   : > { %1111 = vmatpush.msra.mxu0 %v1102_v18  ;;  %v1089_v31 = vld [vmem:[%s1972_s4] sm:$0xff] }
 0x2f2   : > { %v1326_v32 = vld [vmem:[%s1973_s5] ss:$0 sm:$0xff] }
 0x2f3   : > { %1112 = vmatpush.msra.mxu0 %v1101_v19 }
 0x2f5   : > { %1113 = vmatpush.msra.mxu0 %v1100_v20 }
 0x2f7   : > { %1114 = vmatpush.msra.mxu0 %v1099_v22 }
 0x2f9   : > { %1115 = vmatpush.msra.mxu0 %v1098_v23 }
 0x2fb   : > { %1116 = vmatpush.msra.mxu0 %v1097_v21 }
 0x2fd   : > { %1117 = vmatpush.msra.mxu0 %v1096_v24 }
 0x2ff   : > { %1118 = vmatpush.msra.mxu0 %v1095_v25 }
 0x301   : > { %1119 = vmatpush.msra.mxu0 %v1094_v27 }
 0x303   : > { %1120 = vmatpush.msra.mxu0 %v1093_v28 }
 0x305   : > { %1121 = vmatpush.msra.mxu0 %v1092_v29 }
 0x307   : > { %1122 = vmatpush.msra.mxu0 %v1091_v30 }
 0x309   : > { %1123 = vmatpush.msra.mxu0 %v1090_v60 }
 0x30b   : > { %1124 = vmatpush.msra.mxu0 %v1089_v31 }
 0x30c   : > { %1125 = vmatmul.f32.vlgmr.msra.gmra.mxu0 %v1078_v16 }
 0x389   : > { %v1126_v33 = vpop.f32.mrf.mxu0 }
 0x38a   : > { %v1127_v34 = vadd.f32 %v1326_v32, %v1126_v33 }
 0x38c   : > { %1130 = vst.msk [vmem:[%s1974_s6] sm:$0xff] %vm1129_vm1, %v1127_v34 }
 0x38d PF: > { %s17_s21 = sadd.s32 1, %s1367_s21  }
 0x38e   : > { %p14_p9 = scmp.ge.s32.totalorder %s17_s21, 4  }
 0x390   :  { %16 = sbr.rel (!%p14_p9) target bundleno = 1 (0x1), region = 87 }
 0x395   :  { %1142 = vsyncpa [#allocation6], 1 }
 0x396   :  { %1144 = vsyncpa [#allocation6 + $0x1], 1 }

</bundles_post_ra>
